<compile_context>
chip_gen: v5e
topology: v5e:2x2
jax: 0.10.0
libtpu: 0.0.40
codegen_flags: <defaults>
</compile_context>

<pallas_src>
import jax
import jax.numpy as jnp
from jax.experimental import pallas as pl
from jax.experimental.pallas import tpu as pltpu

IN_DIM = 768
HID_DIM = 256


def _round_up(x: int, m: int) -> int:
    return ((x + m - 1) // m) * m


def _cdiv(a: int, b: int) -> int:
    return -(-a // b)


def _num_tensorcores() -> int:
    """TensorCores per chip: v7x has 2, v5e/v6e have 1."""
    try:
        kind = jax.devices()[0].device_kind.lower()
    except Exception:
        return 1
    return 2 if ("v7" in kind or "tpu7" in kind) else 1


def _select_tile(B: int, tm: int, num_tc: int):
    """Pick the batch tile + grid length.

    * 1-TC chips (v5e/v6e): single full-array block for small batches (no masking,
      no extra grid steps), otherwise tiles of `tm`.
    * 2-TC chips (v7x): prefer an even, balanced grid so both TensorCores get work.
    """
    tm = max(8, _round_up(int(tm), 8))
    if B <= tm:
        if num_tc < 2 or B <= 8:
            tm_eff = B                      # one block == whole array (always legal)
        else:
            tm_eff = max(8, _round_up(_cdiv(B, 2), 8))   # split across 2 TCs
    else:
        tm_eff = tm
    grid_m = _cdiv(B, tm_eff)
    if num_tc >= 2 and grid_m > 1 and grid_m % 2 == 1:
        # Re-balance so grid_m is even (avoids one idle TC on the trailing step).
        tm_eff = max(8, _round_up(_cdiv(B, grid_m + 1), 8))
        grid_m = _cdiv(B, tm_eff)
    return tm_eff, grid_m


def _ae_kernel(x_ref, w_enc_ref, b_enc_ref, w_dec_ref, b_dec_ref, out_ref):
    # x_ref:     (TM, 768)   native input dtype (cast to compute dtype here, on-chip)
    # w_enc_ref: (768, 256)  compute dtype, b_enc_ref: (1, 256) f32
    # w_dec_ref: (256, 768)  compute dtype, b_dec_ref: (1, 768) f32
    # out_ref:   (TM, 768)   output dtype
    x = x_ref[...].astype(w_enc_ref.dtype)

    # encoder: h = relu(x @ W_enc + b_enc), f32 accumulation on the MXU
    h = jnp.dot(x, w_enc_ref[...], preferred_element_type=jnp.float32)
    h = jnp.maximum(h + b_enc_ref[...], 0.0)

    # decoder: y = h @ W_dec + b_dec
    y = jnp.dot(h.astype(w_dec_ref.dtype), w_dec_ref[...],
                preferred_element_type=jnp.float32)
    y = y + b_dec_ref[...]

    out_ref[...] = y.astype(out_ref.dtype)


def my_ae_256(x, w_enc, b_enc, w_dec, b_dec, *, tm=1024,
              compute_dtype=jnp.bfloat16, out_dtype=None):
    """Fused autoencoder forward.

    x:      [B, 768]
    w_enc:  [768, 256]  (transposed PyTorch nn.Linear weight)
    b_enc:  [256]
    w_dec:  [256, 768]
    b_dec:  [768]
    returns [B, 768] in `out_dtype` (defaults to x.dtype).

    Notes:
      * compute_dtype=jnp.bfloat16 (default) changes numerics vs an f32 PyTorch
        reference (f32 accumulation, bf16 operands).  Use compute_dtype=jnp.float32
        for bit-accurate results (slow on v5e: its MXU is bf16-only).
      * For repeated calls, jit this wrapper (or pre-cast the weights) so the
        weight dtype casts constant-fold.
    """
    B, D = x.shape
    assert D == IN_DIM
    out_dtype = x.dtype if out_dtype is None else out_dtype

    num_tc = _num_tensorcores()
    tm_eff, grid_m = _select_tile(B, tm, num_tc)

    # --- operand prep (no pad / no post-slice: Pallas masks the ragged tail) ----
    w_enc_c = w_enc if w_enc.dtype == compute_dtype else w_enc.astype(compute_dtype)
    w_dec_c = w_dec if w_dec.dtype == compute_dtype else w_dec.astype(compute_dtype)
    b_enc2 = b_enc.reshape(1, HID_DIM).astype(jnp.float32)
    b_dec2 = b_dec.reshape(1, IN_DIM).astype(jnp.float32)

    cbytes = jnp.dtype(compute_dtype).itemsize
    cost = pl.CostEstimate(
        flops=4 * B * IN_DIM * HID_DIM,                              # two matmuls
        transcendentals=0,
        bytes_accessed=(B * IN_DIM * x.dtype.itemsize                # x (native dtype)
                        + B * IN_DIM * jnp.dtype(out_dtype).itemsize  # out
                        + 2 * IN_DIM * HID_DIM * cbytes              # weights
                        + (IN_DIM + HID_DIM) * 4),                   # biases
    )

    # Constant-index operands only need single buffering once the batch tile is big
    # enough that double-buffer VMEM starts to matter (v7x headroom).
    def _const_spec(shape):
        if tm_eff >= 2048:
            return pl.BlockSpec(shape, lambda i: (0, 0), pipeline_mode=pl.Buffered(1))
        return pl.BlockSpec(shape, lambda i: (0, 0))

    out = pl.pallas_call(
        _ae_kernel,
        out_shape=jax.ShapeDtypeStruct((B, IN_DIM), out_dtype),
        grid_spec=pltpu.PrefetchScalarGridSpec(
            num_scalar_prefetch=0,
            grid=(grid_m,),
            in_specs=[
                pl.BlockSpec((tm_eff, IN_DIM), lambda i: (i, 0)),   # x tile (native dtype)
                _const_spec((IN_DIM, HID_DIM)),                      # W_enc (resident)
                _const_spec((1, HID_DIM)),                           # b_enc
                _const_spec((HID_DIM, IN_DIM)),                      # W_dec (resident)
                _const_spec((1, IN_DIM)),                            # b_dec
            ],
            out_specs=pl.BlockSpec((tm_eff, IN_DIM), lambda i: (i, 0)),
        ),
        compiler_params=pltpu.CompilerParams(
            dimension_semantics=("parallel",),
            vmem_limit_bytes=48 * 1024 * 1024,
        ),
        cost_estimate=cost,
    )(x, w_enc_c, b_enc2, w_dec_c, b_dec2)

    return out


def _reference(x, w_enc, b_enc, w_dec, b_dec):
    h = jnp.maximum(x @ w_enc + b_enc, 0.0)
    return h @ w_dec + b_dec


if __name__ == "__main__":
    key = jax.random.PRNGKey(0)
    k_x, k_we, k_be, k_wd, k_bd = jax.random.split(key, 5)

    # Small, deliberately non-multiple-of-8 batch to exercise the ragged / masked
    # last-block path (and, on v7x, the even-grid split).
    B = 20

    # Deterministic synthetic parameters; shapes match nn.Linear(768,256)/(256,768),
    # stored transposed as [in_features, out_features].
    x = jax.random.normal(k_x, (B, IN_DIM), dtype=jnp.float32)
    w_enc = jax.random.normal(k_we, (IN_DIM, HID_DIM), dtype=jnp.float32) * 0.02
    b_enc = jax.random.normal(k_be, (HID_DIM,), dtype=jnp.float32) * 0.02
    w_dec = jax.random.normal(k_wd, (HID_DIM, IN_DIM), dtype=jnp.float32) * 0.02
    b_dec = jax.random.normal(k_bd, (IN_DIM,), dtype=jnp.float32) * 0.02

    ref = _reference(x, w_enc, b_enc, w_dec, b_dec)

    # bf16 MXU operands (default fast path): f32 accumulation, looser tolerance.
    out_bf16 = jax.block_until_ready(my_ae_256(x, w_enc, b_enc, w_dec, b_dec))
    assert out_bf16.shape == (B, IN_DIM)
    assert out_bf16.dtype == x.dtype
    assert jnp.allclose(out_bf16, ref, atol=5e-2, rtol=5e-2), "bf16 path mismatch"

    # Full-precision path: f32 operands, tight tolerance.
    out_f32 = jax.block_until_ready(
        my_ae_256(x, w_enc, b_enc, w_dec, b_dec, compute_dtype=jnp.float32))
    assert jnp.allclose(out_f32, ref, atol=1e-4, rtol=1e-4), "f32 path mismatch"

    # Optional bf16 output (halves writeback traffic on this mem-bound kernel).
    out_lo = jax.block_until_ready(
        my_ae_256(x, w_enc, b_enc, w_dec, b_dec, out_dtype=jnp.bfloat16))
    assert out_lo.dtype == jnp.bfloat16 and out_lo.shape == (B, IN_DIM)
    assert jnp.allclose(out_lo.astype(jnp.float32), ref, atol=1e-1, rtol=1e-1)

    print("KERNEL_OK")
</pallas_src>

<mosaic_0001>
module attributes {stable_mosaic.version = 11 : i64} {
  func.func @_ae_kernel(%arg0: i32, %arg1: memref<20x768xf32, #tpu.memory_space<vmem>>, %arg2: memref<768x256xbf16, #tpu.memory_space<vmem>>, %arg3: memref<1x256xf32, #tpu.memory_space<vmem>>, %arg4: memref<256x768xbf16, #tpu.memory_space<vmem>>, %arg5: memref<1x768xf32, #tpu.memory_space<vmem>>, %arg6: memref<20x768xf32, #tpu.memory_space<vmem>>) attributes {dimension_semantics = [#tpu.dimension_semantics<parallel>], iteration_bounds = array<i64: 1>, scalar_prefetch = 0 : i64, scratch_operands = 0 : i64, tpu.core_type = #tpu.core_type<tc>, window_params = [{transform_indices = @transform_0, window_bounds = array<i64: 20, 768>}, {pipeline_mode = #tpu.pipeline_mode<synchronous>, transform_indices = @transform_1, window_bounds = array<i64: 768, 256>}, {pipeline_mode = #tpu.pipeline_mode<synchronous>, transform_indices = @transform_2, window_bounds = array<i64: 1, 256>}, {pipeline_mode = #tpu.pipeline_mode<synchronous>, transform_indices = @transform_3, window_bounds = array<i64: 256, 768>}, {pipeline_mode = #tpu.pipeline_mode<synchronous>, transform_indices = @transform_4, window_bounds = array<i64: 1, 768>}, {transform_indices = @transform_5, window_bounds = array<i64: 20, 768>}]} {
    %c0 = arith.constant 0 : index
    %c0_0 = arith.constant 0 : index
    %0 = vector.load %arg1[%c0, %c0_0] : memref<20x768xf32, #tpu.memory_space<vmem>>, vector<20x768xf32>
    %1 = arith.truncf %0 : vector<20x768xf32> to vector<20x768xbf16>
    %c0_1 = arith.constant 0 : index
    %c0_2 = arith.constant 0 : index
    %2 = vector.load %arg2[%c0_1, %c0_2] : memref<768x256xbf16, #tpu.memory_space<vmem>>, vector<768x256xbf16>
    %cst = arith.constant dense<0.000000e+00> : vector<20x256xf32>
    %3 = tpu.matmul %1, %2, %cst {dimension_numbers = #tpu.dot_dimension_numbers<[1], [0], [0], [1], [0, 0, 1, 1], [], []>} : vector<20x768xbf16>, vector<768x256xbf16>, vector<20x256xf32> -> vector<20x256xf32>
    %c0_3 = arith.constant 0 : index
    %c0_4 = arith.constant 0 : index
    %4 = vector.load %arg3[%c0_3, %c0_4] : memref<1x256xf32, #tpu.memory_space<vmem>>, vector<1x256xf32>
    %5 = vector.broadcast %4 : vector<1x256xf32> to vector<20x256xf32>
    %6 = arith.addf %3, %5 : vector<20x256xf32>
    %cst_5 = arith.constant 0.000000e+00 : f32
    %7 = vector.broadcast %cst_5 : f32 to vector<20x256xf32>
    %8 = arith.maximumf %6, %7 : vector<20x256xf32>
    %9 = arith.truncf %8 : vector<20x256xf32> to vector<20x256xbf16>
    %c0_6 = arith.constant 0 : index
    %c0_7 = arith.constant 0 : index
    %10 = vector.load %arg4[%c0_6, %c0_7] : memref<256x768xbf16, #tpu.memory_space<vmem>>, vector<256x768xbf16>
    %cst_8 = arith.constant dense<0.000000e+00> : vector<20x768xf32>
    %11 = tpu.matmul %9, %10, %cst_8 {dimension_numbers = #tpu.dot_dimension_numbers<[1], [0], [0], [1], [0, 0, 1, 1], [], []>} : vector<20x256xbf16>, vector<256x768xbf16>, vector<20x768xf32> -> vector<20x768xf32>
    %c0_9 = arith.constant 0 : index
    %c0_10 = arith.constant 0 : index
    %12 = vector.load %arg5[%c0_9, %c0_10] : memref<1x768xf32, #tpu.memory_space<vmem>>, vector<1x768xf32>
    %13 = vector.broadcast %12 : vector<1x768xf32> to vector<20x768xf32>
    %14 = arith.addf %11, %13 : vector<20x768xf32>
    %c0_11 = arith.constant 0 : index
    %c0_12 = arith.constant 0 : index
    %15 = vector.load %arg6[%c0_11, %c0_12] : memref<20x768xf32, #tpu.memory_space<vmem>>, vector<20x768xf32>
    tpu.vector_store %arg6[%c0_11, %c0_12], %14 {strides = array<i32>} : memref<20x768xf32, #tpu.memory_space<vmem>>, vector<20x768xf32>,
    return
  }
  func.func @transform_0(%arg0: i32) -> (i32, i32) {
    %c0_i32 = arith.constant 0 : i32
    %c0_i32_0 = arith.constant 0 : i32
    return %arg0, %c0_i32 : i32, i32
  }
  func.func @transform_1(%arg0: i32) -> (i32, i32) {
    %c0_i32 = arith.constant 0 : i32
    %c0_i32_0 = arith.constant 0 : i32
    %c0_i32_1 = arith.constant 0 : i32
    return %c0_i32, %c0_i32_0 : i32, i32
  }
  func.func @transform_2(%arg0: i32) -> (i32, i32) {
    %c0_i32 = arith.constant 0 : i32
    %c0_i32_0 = arith.constant 0 : i32
    %c0_i32_1 = arith.constant 0 : i32
    return %c0_i32, %c0_i32_0 : i32, i32
  }
  func.func @transform_3(%arg0: i32) -> (i32, i32) {
    %c0_i32 = arith.constant 0 : i32
    %c0_i32_0 = arith.constant 0 : i32
    %c0_i32_1 = arith.constant 0 : i32
    return %c0_i32, %c0_i32_0 : i32, i32
  }
  func.func @transform_4(%arg0: i32) -> (i32, i32) {
    %c0_i32 = arith.constant 0 : i32
    %c0_i32_0 = arith.constant 0 : i32
    %c0_i32_1 = arith.constant 0 : i32
    return %c0_i32, %c0_i32_0 : i32, i32
  }
  func.func @transform_5(%arg0: i32) -> (i32, i32) {
    %c0_i32 = arith.constant 0 : i32
    %c0_i32_0 = arith.constant 0 : i32
    return %arg0, %c0_i32 : i32, i32
  }
}

</mosaic_0001>

<bundles_post_ra>
// kernel: tpu_custom_call.1
= control target key start
LH: loop header
LB: loop body
LE: loop exit
PB: predicated region body
PF: predicated region fallthrough
CT: control target
= control target key end

     0   :  { %10 = vsyncpa [#allocation3], 0  ;;  %s3108_s0 = inlined_call_operand.hbm [shape: f32[20,768], index: 0, kind: input, shape index: {}]   ;;  %s3109_s1 = inlined_call_operand.hbm [shape: bf16[768,256], index: 1, kind: input, shape index: {}]   ;;  %s3110_s2 = inlined_call_operand.hbm [shape: f32[1,256], index: 2, kind: input, shape index: {}]   ;;  %s3111_s3 = inlined_call_operand.hbm [shape: bf16[256,768], index: 3, kind: input, shape index: {}]   ;;  %s3112_s4 = inlined_call_operand.hbm [shape: f32[1,768], index: 4, kind: input, shape index: {}]   ;;  %s3113_s5 = inlined_call_operand.hbm [shape: f32[20,768], index: 5, kind: output, shape index: {}]  }
   0x1   :  { %11 = vsyncpa [#allocation6], 0 }
   0x2   :  { %12 = vsyncpa [#allocation9], 0  ;;  %s31_s20 = sshll.u32 %s3109_s1, 4  ;;  %s32_s20 = int_to_ptr.hbm [resolvable:$true] %s31_s20 }
   0x3   :  { %13 = vsyncpa [#allocation4], 0  ;;  %s2902_s21 = smov [#allocation5]   ;;  %s55_s25 = sshll.u32 %s3111_s3, 4  ;;  %s56_s25 = int_to_ptr.hbm [resolvable:$true] %s55_s25 }
   0x4   :  { %s33_s22 = sshll.u32 %s2902_s21, 4  ;;  %s2903_s26 = smov 128   ;;  %s34_s22 = int_to_ptr.vmem [resolvable:$true] %s33_s22 }
   0x5   :  { %s2904_s27 = smov 8   ;;  %s2905_s28 = smov [#allocation8]  }
   0x6   :  { %39 = dma.hbm_to_vmem [thread:$0]  %s32_s20, 12288, %s34_s22, [#allocation6], %s2903_s26, %s2903_s26, %s2904_s27  }
   0x7   :  { %s57_s29 = sshll.u32 %s2905_s28, 4  ;;  %s2906_s30 = smov 384   ;;  %s58_s29 = int_to_ptr.vmem [resolvable:$true] %s57_s29 }
   0x8   :  { %s2907_s6 = smov 24   ;;  %s18_s8 = sshll.u32 %s3108_s0, 4  ;;  %s19_s8 = int_to_ptr.hbm [resolvable:$true] %s18_s8 }
   0x9   :  { %63 = dma.hbm_to_vmem [thread:$0]  %s56_s25, 12288, %s58_s29, [#allocation9], %s2906_s30, %s2906_s30, %s2907_s6  }
   0xa   :  { %s2908_s9 = smov [#allocation2]   ;;  %s45_s12 = sshll.u32 %s3110_s2, 4  ;;  %s46_s12 = int_to_ptr.hbm [resolvable:$true] %s45_s12 }
   0xb   :  { %s20_s10 = sshll.u32 %s2908_s9, 4  ;;  %s2909_s13 = smov 768   ;;  %s21_s10 = int_to_ptr.vmem [resolvable:$true] %s20_s10 }
   0xc   :  { %s2910_s14 = smov 48   ;;  %s2911_s15 = smov [#allocation7]  }
   0xd   :  { %26 = dma.hbm_to_vmem [thread:$0]  %s19_s8, 2304, %s21_s10, [#allocation3], %s2909_s13, %s2909_s13, %s2910_s14  }
   0xe   :  { %s47_s16 = sshll.u32 %s2911_s15, 4  ;;  %s69_s0 = sshll.u32 %s3112_s4, 4  ;;  %s48_s16 = int_to_ptr.vmem [resolvable:$true] %s47_s16  ;;  %s70_s0 = int_to_ptr.hbm [resolvable:$true] %s69_s0 }
   0xf   :  { %50 = dma.hbm_to_vmem [thread:$0]  %s46_s12, 32, %s48_s16, [#allocation6]  }
  0x10   :  { %s2912_s19 = smov [#allocation10]  }
  0x11   :  { %s71_s20 = sshll.u32 %s2912_s19, 4  ;;  %s72_s20 = int_to_ptr.vmem [resolvable:$true] %s71_s20 }
  0x12   :  { %74 = dma.hbm_to_vmem [thread:$0]  %s70_s0, 96, %s72_s20, [#allocation9]  }
  0x13   :  { %2894 = dma.done.wait [#allocation3], 2304  }
  0x14   :  { %2895 = vsyncadd [#allocation3], 4294964992 }
  0x15   :  { %2896 = dma.done.wait [#allocation6], 12320  }
  0x16   :  { %2897 = vsyncadd [#allocation6], 4294954976 }
  0x17   :  { %2898 = dma.done.wait [#allocation9], 12384  }
  0x18   :  { %2899 = vsyncadd [#allocation9], 4294954912  ;;  %v1836_v0 = vld [vmem:[#allocation5 + $0x70] sm:$0xf]  ;;  %v2561_v1 = vld [vmem:[#allocation5 + $0x74] sm:$0xf0] }
  0x19   :  { %v1900_v2 = vld [vmem:[#allocation5 + $0xf0] sm:$0xf]  ;;  %v1837_v3 = vor.u32 %v2561_v1, %v1836_v0  ;;  %v2577_v4 = vld [vmem:[#allocation5 + $0xf4] sm:$0xf0]  ;;  %v1828_v11 = vld [vmem:[#allocation5 + $0x60] sm:$0xf] }
  0x1a   :  { %v1964_v5 = vld [vmem:[#allocation5 + $0x170] sm:$0xf]  ;;  %v2593_v6 = vld [vmem:[#allocation5 + $0x174] sm:$0xf0]  ;;  %v1901_v7 = vor.u32 %v2577_v4, %v1900_v2  ;;  %v2559_v13 = vld [vmem:[#allocation5 + $0x64] sm:$0xf0] }
  0x1b   :  { %v1965_v8 = vor.u32 %v2593_v6, %v1964_v5  ;;  %v2028_v9 = vld [vmem:[#allocation5 + $0x1f0] sm:$0xf]  ;;  %v2609_v10 = vld [vmem:[#allocation5 + $0x1f4] sm:$0xf0]  ;;  %707 = vmatpush.bf16.msra.mxu0 %v1837_v3  ;;  %v1892_v14 = vld [vmem:[#allocation5 + $0xe0] sm:$0xf]  ;;  %v1829_v16 = vor.u32 %v2559_v13, %v1828_v11 }
  0x1c   :  { %v2029_v12 = vor.u32 %v2609_v10, %v2028_v9  ;;  %v2575_v15 = vld [vmem:[#allocation5 + $0xe4] sm:$0xf0]  ;;  %725 = vmatpush.bf16.msra.mxu1 %v1901_v7  ;;  %v1956_v18 = vld [vmem:[#allocation5 + $0x160] sm:$0xf]  ;;  %v1820_v23 = vld [vmem:[#allocation5 + $0x50] sm:$0xf] }
  0x1d   :  { %743 = vmatpush.bf16.msra.mxu2 %v1965_v8  ;;  %v1893_v17 = vor.u32 %v2575_v15, %v1892_v14  ;;  %v2591_v19 = vld [vmem:[#allocation5 + $0x164] sm:$0xf0]  ;;  %v2020_v20 = vld [vmem:[#allocation5 + $0x1e0] sm:$0xf]  ;;  %v2557_v24 = vld [vmem:[#allocation5 + $0x54] sm:$0xf0] }
  0x1e   :  { %761 = vmatpush.bf16.msra.mxu3 %v2029_v12  ;;  %v1957_v21 = vor.u32 %v2591_v19, %v1956_v18  ;;  %v2607_v22 = vld [vmem:[#allocation5 + $0x1e4] sm:$0xf0]  ;;  %v1884_v26 = vld [vmem:[#allocation5 + $0xd0] sm:$0xf]  ;;  %v2573_v27 = vld [vmem:[#allocation5 + $0xd4] sm:$0xf0]  ;;  %v1821_v29 = vor.u32 %v2557_v24, %v1820_v23 }
  0x1f   :  { %v2021_v25 = vor.u32 %v2607_v22, %v2020_v20  ;;  %v1948_v28 = vld [vmem:[#allocation5 + $0x150] sm:$0xf]  ;;  %708 = vmatpush.bf16.msra.mxu0 %v1829_v16  ;;  %v2589_v30 = vld [vmem:[#allocation5 + $0x154] sm:$0xf0]  ;;  %v1885_v33 = vor.u32 %v2573_v27, %v1884_v26  ;;  %v1812_v35 = vld [vmem:[#allocation5 + $0x40] sm:$0xf] }
  0x20   :  { %v2012_v31 = vld [vmem:[#allocation5 + $0x1d0] sm:$0xf]  ;;  %v2605_v32 = vld [vmem:[#allocation5 + $0x1d4] sm:$0xf0]  ;;  %726 = vmatpush.bf16.msra.mxu1 %v1893_v17  ;;  %v1949_v34 = vor.u32 %v2589_v30, %v1948_v28  ;;  %v2555_v36 = vld [vmem:[#allocation5 + $0x44] sm:$0xf0] }
  0x21   :  { %744 = vmatpush.bf16.msra.mxu2 %v1957_v21  ;;  %v1876_v37 = vld [vmem:[#allocation5 + $0xc0] sm:$0xf]  ;;  %v2013_v38 = vor.u32 %v2605_v32, %v2012_v31  ;;  %v2571_v39 = vld [vmem:[#allocation5 + $0xc4] sm:$0xf0]  ;;  %v1813_v44 = vor.u32 %v2555_v36, %v1812_v35  ;;  %v1804_v47 = vld [vmem:[#allocation5 + $0x30] sm:$0xf] }
  0x22   :  { %762 = vmatpush.bf16.msra.mxu3 %v2021_v25  ;;  %v1940_v40 = vld [vmem:[#allocation5 + $0x140] sm:$0xf]  ;;  %v2587_v41 = vld [vmem:[#allocation5 + $0x144] sm:$0xf0]  ;;  %v1877_v45 = vor.u32 %v2571_v39, %v1876_v37  ;;  %v2553_v48 = vld [vmem:[#allocation5 + $0x34] sm:$0xf0] }
  0x23   :  { %v2004_v42 = vld [vmem:[#allocation5 + $0x1c0] sm:$0xf]  ;;  %v2603_v43 = vld [vmem:[#allocation5 + $0x1c4] sm:$0xf0]  ;;  %709 = vmatpush.bf16.msra.mxu0 %v1821_v29  ;;  %v1941_v46 = vor.u32 %v2587_v41, %v1940_v40  ;;  %v1868_v49 = vld [vmem:[#allocation5 + $0xb0] sm:$0xf]  ;;  %v1805_v56 = vor.u32 %v2553_v48, %v1804_v47 }
  0x24   :  { %727 = vmatpush.bf16.msra.mxu1 %v1885_v33  ;;  %v2005_v50 = vor.u32 %v2603_v43, %v2004_v42  ;;  %v2569_v51 = vld [vmem:[#allocation5 + $0xb4] sm:$0xf0]  ;;  %v1932_v52 = vld [vmem:[#allocation5 + $0x130] sm:$0xf]  ;;  %v1796_v59 = vld [vmem:[#allocation5 + $0x20] sm:$0xf] }
  0x25   :  { %745 = vmatpush.bf16.msra.mxu2 %v1949_v34  ;;  %v2585_v53 = vld [vmem:[#allocation5 + $0x134] sm:$0xf0]  ;;  %v1996_v54 = vld [vmem:[#allocation5 + $0x1b0] sm:$0xf]  ;;  %v1869_v57 = vor.u32 %v2569_v51, %v1868_v49  ;;  %v2551_v60 = vld [vmem:[#allocation5 + $0x24] sm:$0xf0] }
  0x26   :  { %763 = vmatpush.bf16.msra.mxu3 %v2013_v38  ;;  %v2601_v55 = vld [vmem:[#allocation5 + $0x1b4] sm:$0xf0]  ;;  %v1933_v58 = vor.u32 %v2585_v53, %v1932_v52  ;;  %v1860_v61 = vld [vmem:[#allocation5 + $0xa0] sm:$0xf]  ;;  %v2567_v63 = vld [vmem:[#allocation5 + $0xa4] sm:$0xf0]  ;;  %v1797_v4 = vor.u32 %v2551_v60, %v1796_v59 }
  0x27   :  { %710 = vmatpush.bf16.msra.mxu0 %v1813_v44  ;;  %v1997_v62 = vor.u32 %v2601_v55, %v1996_v54  ;;  %v1924_v0 = vld [vmem:[#allocation5 + $0x120] sm:$0xf]  ;;  %v2583_v1 = vld [vmem:[#allocation5 + $0x124] sm:$0xf0]  ;;  %v1861_v5 = vor.u32 %v2567_v63, %v1860_v61  ;;  %v1788_v7 = vld [vmem:[#allocation5 + $0x10] sm:$0xf] }
  0x28   :  { %728 = vmatpush.bf16.msra.mxu1 %v1877_v45  ;;  %v1988_v2 = vld [vmem:[#allocation5 + $0x1a0] sm:$0xf]  ;;  %v2599_v3 = vld [vmem:[#allocation5 + $0x1a4] sm:$0xf0]  ;;  %v1925_v6 = vor.u32 %v2583_v1, %v1924_v0  ;;  %v2549_v8 = vld [vmem:[#allocation5 + $0x14] sm:$0xf0] }
  0x29   :  { %746 = vmatpush.bf16.msra.mxu2 %v1941_v46  ;;  %v1852_v9 = vld [vmem:[#allocation5 + $0x90] sm:$0xf]  ;;  %v1989_v10 = vor.u32 %v2599_v3, %v1988_v2  ;;  %v2565_v11 = vld [vmem:[#allocation5 + $0x94] sm:$0xf0]  ;;  %v1780_v16 = vld [vmem:[#allocation5] sm:$0xf]  ;;  %v1789_v17 = vor.u32 %v2549_v8, %v1788_v7 }
  0x2a   :  { %764 = vmatpush.bf16.msra.mxu3 %v2005_v50  ;;  %v1916_v12 = vld [vmem:[#allocation5 + $0x110] sm:$0xf]  ;;  %v2581_v13 = vld [vmem:[#allocation5 + $0x114] sm:$0xf0]  ;;  %v2547_v18 = vld [vmem:[#allocation5 + $0x4] sm:$0xf0]  ;;  %v1853_v21 = vor.u32 %v2565_v11, %v1852_v9 }
  0x2b   :  { %711 = vmatpush.bf16.msra.mxu0 %v1805_v56  ;;  %v1980_v14 = vld [vmem:[#allocation5 + $0x190] sm:$0xf]  ;;  %v2597_v15 = vld [vmem:[#allocation5 + $0x194] sm:$0xf0]  ;;  %v1844_v19 = vld [vmem:[#allocation5 + $0x80] sm:$0xf]  ;;  %v1917_v22 = vor.u32 %v2581_v13, %v1916_v12  ;;  %v1781_v34 = vor.u32 %v2547_v18, %v1780_v16 }
  0x2c   :  { %729 = vmatpush.bf16.msra.mxu1 %v1869_v57  ;;  %v2563_v20 = vld [vmem:[#allocation5 + $0x84] sm:$0xf0]  ;;  %v1908_v23 = vld [vmem:[#allocation5 + $0x100] sm:$0xf]  ;;  %v1981_v26 = vor.u32 %v2597_v15, %v1980_v14  ;;  %v95_v28 = vld [vmem:[#allocation2] sm:$0xff]  ;;  %s2913_s2 = smov [#allocation11]  }
  0x2d   :  { %747 = vmatpush.bf16.msra.mxu2 %v1933_v58  ;;  %v2579_v24 = vld [vmem:[#allocation5 + $0x104] sm:$0xf0]  ;;  %v1972_v25 = vld [vmem:[#allocation5 + $0x180] sm:$0xf]  ;;  %v96_v30 = vld [vmem:[#allocation2 + $0x8] sm:$0xff]  ;;  %v1845_v38 = vor.u32 %v2563_v20, %v1844_v19  ;;  %s1761_s4 = sshll.u32 %s2913_s2, 4  ;;  %s1762_s4 = int_to_ptr.vmem [resolvable:$true] %s1761_s4 }
  0x2e   :  { %765 = vmatpush.bf16.msra.mxu3 %v1997_v62  ;;  %v2595_v27 = vld [vmem:[#allocation5 + $0x184] sm:$0xf0]  ;;  %v101_v29 = vld [vmem:[#allocation2 + $0x30] sm:$0xff]  ;;  %v2560_v32 = vld [vmem:[#allocation5 + $0x74] sm:$0xf]  ;;  %v1909_v39 = vor.u32 %v2579_v24, %v1908_v23  ;;  %s1763_s23 = sshll.u32 %s3113_s5, 4  ;;  %s1764_s23 = int_to_ptr.hbm [resolvable:$true] %s1763_s23 }
  0x2f   :  { %712 = vmatpush.bf16.msra.mxu0 %v1797_v4  ;;  %v102_v31 = vld [vmem:[#allocation2 + $0x38] sm:$0xff]  ;;  %v1838_v33 = vld [vmem:[#allocation5 + $0x78] sm:$0xf0]  ;;  %v97_v35 = vld [vmem:[#allocation2 + $0x10] sm:$0xff]  ;;  %v1973_v43 = vor.u32 %v2595_v27, %v1972_v25  ;;  %v2962_v48 = vpack.c.bf16 %v101_v29, %v95_v28 }
  0x30   :  { %730 = vmatpush.bf16.msra.mxu1 %v1861_v5  ;;  %v2156_v36 = vld [vmem:[#allocation5 + $0x2f0] sm:$0xf]  ;;  %v2641_v37 = vld [vmem:[#allocation5 + $0x2f4] sm:$0xf0]  ;;  %v98_v41 = vld [vmem:[#allocation2 + $0x18] sm:$0xff]  ;;  %v1841_v44 = vor.u32 %v2560_v32, %v1838_v33  ;;  %v2964_v53 = vpack.c.bf16 %v102_v31, %v96_v30 }
  0x31   :  { %748 = vmatpush.bf16.msra.mxu2 %v1925_v6  ;;  %v103_v40 = vld [vmem:[#allocation2 + $0x40] sm:$0xff]  ;;  %v104_v42 = vld [vmem:[#allocation2 + $0x48] sm:$0xff]  ;;  %v2157_v49 = vor.u32 %v2641_v37, %v2156_v36  ;;  %v2558_v51 = vld [vmem:[#allocation5 + $0x64] sm:$0xf] }
  0x32   :  { %766 = vmatpush.bf16.msra.mxu3 %v1989_v10  ;;  %v2092_v45 = vld [vmem:[#allocation5 + $0x270] sm:$0xf]  ;;  %v2625_v46 = vld [vmem:[#allocation5 + $0x274] sm:$0xf0]  ;;  %v2576_v47 = vld [vmem:[#allocation5 + $0xf4] sm:$0xf]  ;;  %v2966_v54 = vpack.c.bf16 %v103_v40, %v97_v35  ;;  %v2968_v57 = vpack.c.bf16 %v104_v42, %v98_v41 }
  0x33   :  { %713 = vmatpush.bf16.msra.mxu0 %v1789_v17  ;;  %v1902_v50 = vld [vmem:[#allocation5 + $0xf8] sm:$0xf0]  ;;  %v1830_v52 = vld [vmem:[#allocation5 + $0x68] sm:$0xf0]  ;;  %v2148_v55 = vld [vmem:[#allocation5 + $0x2e0] sm:$0xf]  ;;  %v2093_v58 = vor.u32 %v2625_v46, %v2092_v45 }
  0x34   :  { %731 = vmatpush.bf16.msra.mxu1 %v1853_v21  ;;  %v2639_v56 = vld [vmem:[#allocation5 + $0x2e4] sm:$0xf0]  ;;  %v1905_v59 = vor.u32 %v2576_v47, %v1902_v50  ;;  %v1833_v60 = vor.u32 %v2558_v51, %v1830_v52  ;;  %v2084_v61 = vld [vmem:[#allocation5 + $0x260] sm:$0xf]  ;;  %v2574_v63 = vld [vmem:[#allocation5 + $0xe4] sm:$0xf] }
  0x35   :  { %749 = vmatpush.bf16.msra.mxu2 %v1917_v22  ;;  %v2623_v62 = vld [vmem:[#allocation5 + $0x264] sm:$0xf0]  ;;  %v2149_v0 = vor.u32 %v2639_v56, %v2148_v55  ;;  %v1894_v1 = vld [vmem:[#allocation5 + $0xe8] sm:$0xf0]  ;;  %v2556_v2 = vld [vmem:[#allocation5 + $0x54] sm:$0xf] }
  0x36   :  { %767 = vmatpush.bf16.msra.mxu3 %v1981_v26  ;;  %v1822_v3 = vld [vmem:[#allocation5 + $0x58] sm:$0xf0]  ;;  %v2140_v4 = vld [vmem:[#allocation5 + $0x2d0] sm:$0xf]  ;;  %v2637_v5 = vld [vmem:[#allocation5 + $0x2d4] sm:$0xf0]  ;;  %v2085_v6 = vor.u32 %v2623_v62, %v2084_v61  ;;  %v1897_v7 = vor.u32 %v2574_v63, %v1894_v1 }
  0x37   :  { %714 = vmatpush.bf16.msra.mxu0 %v1781_v34  ;;  %v1825_v8 = vor.u32 %v2556_v2, %v1822_v3  ;;  %v2076_v9 = vld [vmem:[#allocation5 + $0x250] sm:$0xf]  ;;  %v2621_v10 = vld [vmem:[#allocation5 + $0x254] sm:$0xf0]  ;;  %v2572_v11 = vld [vmem:[#allocation5 + $0xd4] sm:$0xf]  ;;  %v2141_v12 = vor.u32 %v2637_v5, %v2140_v4 }
  0x38   :  { %732 = vmatpush.bf16.msra.mxu1 %v1845_v38  ;;  %v1886_v13 = vld [vmem:[#allocation5 + $0xd8] sm:$0xf0]  ;;  %v2554_v14 = vld [vmem:[#allocation5 + $0x44] sm:$0xf]  ;;  %v1814_v15 = vld [vmem:[#allocation5 + $0x48] sm:$0xf0]  ;;  %v2077_v18 = vor.u32 %v2621_v10, %v2076_v9 }
  0x39   :  { %750 = vmatpush.bf16.msra.mxu2 %v1909_v39  ;;  %v2132_v16 = vld [vmem:[#allocation5 + $0x2c0] sm:$0xf]  ;;  %v2635_v17 = vld [vmem:[#allocation5 + $0x2c4] sm:$0xf0]  ;;  %v1889_v19 = vor.u32 %v2572_v11, %v1886_v13  ;;  %v1817_v20 = vor.u32 %v2554_v14, %v1814_v15  ;;  %v2570_v23 = vld [vmem:[#allocation5 + $0xc4] sm:$0xf] }
  0x3a   :  { %768 = vmatpush.bf16.msra.mxu3 %v1973_v43  ;;  %715 = vmatmul.bf16.vlgmr.msra.gmra.mxu0 %v2962_v48  ;;  %v2068_v21 = vld [vmem:[#allocation5 + $0x240] sm:$0xf]  ;;  %v2619_v22 = vld [vmem:[#allocation5 + $0x244] sm:$0xf0]  ;;  %v2133_v24 = vor.u32 %v2635_v17, %v2132_v16  ;;  %v1878_v25 = vld [vmem:[#allocation5 + $0xc8] sm:$0xf0] }
  0x3b   :  { %733 = vmatmul.bf16.vlgmr.msra.gmra.mxu1 %v2964_v53  ;;  %779 = vmatpush.bf16.msrb.mxu0 %v2093_v58  ;;  %v2552_v26 = vld [vmem:[#allocation5 + $0x34] sm:$0xf]  ;;  %v1806_v27 = vld [vmem:[#allocation5 + $0x38] sm:$0xf0]  ;;  %v107_v28 = vld [vmem:[#allocation2 + $0x60] sm:$0xf]  ;;  %v2069_v31 = vor.u32 %v2619_v22, %v2068_v21  ;;  %v1881_v35 = vor.u32 %v2570_v23, %v1878_v25 }
  0x3c   :  { %797 = vmatpush.bf16.msrb.mxu1 %v2157_v49  ;;  %751 = vmatmul.bf16.vlgmr.msra.gmra.mxu2 %v2966_v54  ;;  %v2124_v29 = vld [vmem:[#allocation5 + $0x2b0] sm:$0xf]  ;;  %v2633_v30 = vld [vmem:[#allocation5 + $0x2b4] sm:$0xf0]  ;;  %v109_v33 = vld [vmem:[#allocation2 + $0x70] sm:$0xf]  ;;  %v1809_v36 = vor.u32 %v2552_v26, %v1806_v27  ;;  %v2974_v40 = vpack.c.bf16 %v107_v28, %v107_v28 }
  0x3d   :  { %815 = vmatpush.bf16.msrb.mxu2 %v1841_v44  ;;  %769 = vmatmul.bf16.vlgmr.msra.gmra.mxu3 %v2968_v57  ;;  %v108_v32 = vld [vmem:[#allocation2 + $0x68] sm:$0xf]  ;;  %v110_v34 = vld [vmem:[#allocation2 + $0x78] sm:$0xf]  ;;  %v2060_v37 = vld [vmem:[#allocation5 + $0x230] sm:$0xf]  ;;  %v2125_v41 = vor.u32 %v2633_v30, %v2124_v29  ;;  %v2978_v46 = vpack.c.bf16 %v109_v33, %v109_v33 }
  0x3e   :  { %833 = vmatpush.bf16.msrb.mxu3 %v1905_v59  ;;  %v2617_v38 = vld [vmem:[#allocation5 + $0x234] sm:$0xf0]  ;;  %v2568_v39 = vld [vmem:[#allocation5 + $0xb4] sm:$0xf]  ;;  %v1870_v42 = vld [vmem:[#allocation5 + $0xb8] sm:$0xf0]  ;;  %v2976_v45 = vpack.c.bf16 %v108_v32, %v108_v32  ;;  %v2980_v50 = vpack.c.bf16 %v110_v34, %v110_v34 }
  0x3f   :  { %780 = vmatpush.bf16.msrb.mxu0 %v2085_v6  ;;  %v2550_v43 = vld [vmem:[#allocation5 + $0x24] sm:$0xf]  ;;  %v1798_v44 = vld [vmem:[#allocation5 + $0x28] sm:$0xf0]  ;;  %v2116_v47 = vld [vmem:[#allocation5 + $0x2a0] sm:$0xf]  ;;  %v2061_v51 = vor.u32 %v2617_v38, %v2060_v37  ;;  %v1873_v52 = vor.u32 %v2568_v39, %v1870_v42 }
  0x40   :  { %798 = vmatpush.bf16.msrb.mxu1 %v2149_v0  ;;  %v2631_v49 = vld [vmem:[#allocation5 + $0x2a4] sm:$0xf0]  ;;  %v1801_v55 = vor.u32 %v2550_v43, %v1798_v44  ;;  %v2052_v56 = vld [vmem:[#allocation5 + $0x220] sm:$0xf]  ;;  %v2566_v59 = vld [vmem:[#allocation5 + $0xa4] sm:$0xf] }
  0x41   :  { %816 = vmatpush.bf16.msrb.mxu2 %v1833_v60  ;;  %v2615_v58 = vld [vmem:[#allocation5 + $0x224] sm:$0xf0]  ;;  %v2117_v60 = vor.u32 %v2631_v49, %v2116_v47  ;;  %v1862_v61 = vld [vmem:[#allocation5 + $0xa8] sm:$0xf0]  ;;  %v2548_v62 = vld [vmem:[#allocation5 + $0x14] sm:$0xf] }
  0x42   :  { %834 = vmatpush.bf16.msrb.mxu3 %v1897_v7  ;;  %v1790_v63 = vld [vmem:[#allocation5 + $0x18] sm:$0xf0]  ;;  %v2108_v0 = vld [vmem:[#allocation5 + $0x290] sm:$0xf]  ;;  %v2629_v1 = vld [vmem:[#allocation5 + $0x294] sm:$0xf0]  ;;  %v2053_v2 = vor.u32 %v2615_v58, %v2052_v56  ;;  %v1865_v4 = vor.u32 %v2566_v59, %v1862_v61 }
  0x43   :  { %781 = vmatpush.bf16.msrb.mxu0 %v2077_v18  ;;  %v2044_v3 = vld [vmem:[#allocation5 + $0x210] sm:$0xf]  ;;  %v1793_v5 = vor.u32 %v2548_v62, %v1790_v63  ;;  %v2613_v6 = vld [vmem:[#allocation5 + $0x214] sm:$0xf0]  ;;  %v2564_v7 = vld [vmem:[#allocation5 + $0x94] sm:$0xf]  ;;  %v2109_v9 = vor.u32 %v2629_v1, %v2108_v0 }
  0x44   :  { %799 = vmatpush.bf16.msrb.mxu1 %v2141_v12  ;;  %v2546_v10 = vld [vmem:[#allocation5 + $0x4] sm:$0xf]  ;;  %v1782_v11 = vld [vmem:[#allocation5 + $0x8] sm:$0xf0]  ;;  %v2100_v12 = vld [vmem:[#allocation5 + $0x280] sm:$0xf]  ;;  %v2045_v16 = vor.u32 %v2613_v6, %v2044_v3 }
  0x45   :  { %817 = vmatpush.bf16.msrb.mxu2 %v1825_v8  ;;  %v1854_v8 = vld [vmem:[#allocation5 + $0x98] sm:$0xf0]  ;;  %v2627_v13 = vld [vmem:[#allocation5 + $0x284] sm:$0xf0]  ;;  %v2624_v14 = vld [vmem:[#allocation5 + $0x274] sm:$0xf]  ;;  %v1785_v21 = vor.u32 %v2546_v10, %v1782_v11 }
  0x46   :  { %835 = vmatpush.bf16.msrb.mxu3 %v1889_v19  ;;  %v2094_v15 = vld [vmem:[#allocation5 + $0x278] sm:$0xf0]  ;;  %v2036_v17 = vld [vmem:[#allocation5 + $0x200] sm:$0xf]  ;;  %v2608_v18 = vld [vmem:[#allocation5 + $0x1f4] sm:$0xf]  ;;  %v2101_v25 = vor.u32 %v2627_v13, %v2100_v12 }
  0x47   :  { %782 = vmatpush.bf16.msrb.mxu0 %v2069_v31  ;;  %v2030_v19 = vld [vmem:[#allocation5 + $0x1f8] sm:$0xf0]  ;;  %v2611_v22 = vld [vmem:[#allocation5 + $0x204] sm:$0xf0]  ;;  %v2562_v23 = vld [vmem:[#allocation5 + $0x84] sm:$0xf]  ;;  %v2097_v27 = vor.u32 %v2624_v14, %v2094_v15 }
  0x48   :  { %800 = vmatpush.bf16.msrb.mxu1 %v2133_v24  ;;  %v1846_v24 = vld [vmem:[#allocation5 + $0x88] sm:$0xf0]  ;;  %v99_v26 = vld [vmem:[#allocation2 + $0x20] sm:$0xff]  ;;  %v1966_v29 = vld [vmem:[#allocation5 + $0x178] sm:$0xf0]  ;;  %v2033_v31 = vor.u32 %v2608_v18, %v2030_v19 }
  0x49   :  { %818 = vmatpush.bf16.msrb.mxu2 %v1817_v20  ;;  %v1857_v20 = vor.u32 %v2564_v7, %v1854_v8  ;;  %v2592_v28 = vld [vmem:[#allocation5 + $0x174] sm:$0xf]  ;;  %v2158_v32 = vld [vmem:[#allocation5 + $0x2f8] sm:$0xf0]  ;;  %v2622_v33 = vld [vmem:[#allocation5 + $0x264] sm:$0xf]  ;;  %v1849_v39 = vor.u32 %v2562_v23, %v1846_v24 }
  0x4a   :  { %836 = vmatpush.bf16.msrb.mxu3 %v1881_v35  ;;  %720 = vmatmul.bf16.gmra.mxu0 %v2974_v40  ;;  %v2640_v30 = vld [vmem:[#allocation5 + $0x2f4] sm:$0xf]  ;;  %v2086_v34 = vld [vmem:[#allocation5 + $0x268] sm:$0xf0]  ;;  %v2037_v35 = vor.u32 %v2611_v22, %v2036_v17  ;;  %v100_v37 = vld [vmem:[#allocation2 + $0x28] sm:$0xff] }
  0x4b   :  { %738 = vmatmul.bf16.gmra.mxu1 %v2976_v45  ;;  %783 = vmatpush.bf16.msrb.mxu0 %v2061_v51  ;;  %v106_v38 = vld [vmem:[#allocation2 + $0x58] sm:$0xff]  ;;  %v2590_v42 = vld [vmem:[#allocation5 + $0x164] sm:$0xf]  ;;  %v2161_v44 = vor.u32 %v2640_v30, %v2158_v32  ;;  %v2089_v47 = vor.u32 %v2622_v33, %v2086_v34  ;;  %v2620_v59 = vld [vmem:[#allocation5 + $0x254] sm:$0xf] }
  0x4c   :  { %801 = vmatpush.bf16.msrb.mxu1 %v2125_v41  ;;  %756 = vmatmul.bf16.gmra.mxu2 %v2978_v46  ;;  %v1969_v41 = vor.u32 %v2592_v28, %v1966_v29  ;;  %v1958_v43 = vld [vmem:[#allocation5 + $0x168] sm:$0xf0]  ;;  %v2606_v49 = vld [vmem:[#allocation5 + $0x1e4] sm:$0xf]  ;;  %v2988_v56 = vpack.c.bf16 %v106_v38, %v100_v37  ;;  %v2588_v63 = vld [vmem:[#allocation5 + $0x154] sm:$0xf] }
  0x4d   :  { %819 = vmatpush.bf16.msrb.mxu2 %v1809_v36  ;;  %774 = vmatmul.bf16.gmra.mxu3 %v2980_v50  ;;  %v105_v36 = vld [vmem:[#allocation2 + $0x50] sm:$0xff]  ;;  %v2022_v51 = vld [vmem:[#allocation5 + $0x1e8] sm:$0xf0]  ;;  %v1961_v61 = vor.u32 %v2590_v42, %v1958_v43  ;;  %v1950_v0 = vld [vmem:[#allocation5 + $0x158] sm:$0xf0] }
  0x4e   :  { %837 = vmatpush.bf16.msrb.mxu3 %v1873_v52  ;;  %v2638_v52 = vld [vmem:[#allocation5 + $0x2e4] sm:$0xf]  ;;  %v2150_v58 = vld [vmem:[#allocation5 + $0x2e8] sm:$0xf0]  ;;  %v2025_v62 = vor.u32 %v2606_v49, %v2022_v51  ;;  %v2604_v3 = vld [vmem:[#allocation5 + $0x1d4] sm:$0xf] }
  0x4f   :  { %784 = vmatpush.bf16.msrb.mxu0 %v2053_v2  ;;  %v2153_v1 = vor.u32 %v2638_v52, %v2150_v58  ;;  %v2142_v6 = vld [vmem:[#allocation5 + $0x2d8] sm:$0xf0]  ;;  %v2618_v7 = vld [vmem:[#allocation5 + $0x244] sm:$0xf]  ;;  %v2070_v8 = vld [vmem:[#allocation5 + $0x248] sm:$0xf0] }
  0x50   :  { %802 = vmatpush.bf16.msrb.mxu1 %v2117_v60  ;;  %v2078_v60 = vld [vmem:[#allocation5 + $0x258] sm:$0xf0]  ;;  %v2586_v11 = vld [vmem:[#allocation5 + $0x144] sm:$0xf]  ;;  %v1942_v12 = vld [vmem:[#allocation5 + $0x148] sm:$0xf0]  ;;  %v2073_v14 = vor.u32 %v2618_v7, %v2070_v8 }
  0x51   :  { %820 = vmatpush.bf16.msrb.mxu2 %v1801_v55  ;;  %v2986_v55 = vpack.c.bf16 %v105_v36, %v99_v26  ;;  %v2081_v2 = vor.u32 %v2620_v59, %v2078_v60  ;;  %v2602_v15 = vld [vmem:[#allocation5 + $0x1c4] sm:$0xf]  ;;  %v2134_v18 = vld [vmem:[#allocation5 + $0x2c8] sm:$0xf0]  ;;  %v2616_v19 = vld [vmem:[#allocation5 + $0x234] sm:$0xf] }
  0x52   :  { %838 = vmatpush.bf16.msrb.mxu3 %v1865_v4  ;;  %v2014_v4 = vld [vmem:[#allocation5 + $0x1d8] sm:$0xf0]  ;;  %v2634_v17 = vld [vmem:[#allocation5 + $0x2c4] sm:$0xf]  ;;  %v2054_v30 = vld [vmem:[#allocation5 + $0x228] sm:$0xf0] }
  0x53   :  { %785 = vmatpush.bf16.msrb.mxu0 %v2045_v16  ;;  %v2017_v10 = vor.u32 %v2604_v3, %v2014_v4  ;;  %v2006_v16 = vld [vmem:[#allocation5 + $0x1c8] sm:$0xf0]  ;;  %v1934_v22 = vld [vmem:[#allocation5 + $0x138] sm:$0xf0]  ;;  %v2137_v23 = vor.u32 %v2634_v17, %v2134_v18  ;;  %v2614_v29 = vld [vmem:[#allocation5 + $0x224] sm:$0xf] }
  0x54   :  { %803 = vmatpush.bf16.msrb.mxu1 %v2109_v9  ;;  %v1953_v9 = vor.u32 %v2588_v63, %v1950_v0  ;;  %v1998_v26 = vld [vmem:[#allocation5 + $0x1b8] sm:$0xf0]  ;;  %v112_v32 = vld [vmem:[#allocation2 + $0x88] sm:$0xf]  ;;  %v1926_v36 = vld [vmem:[#allocation5 + $0x128] sm:$0xf0]  ;;  %v2057_v38 = vor.u32 %v2614_v29, %v2054_v30 }
  0x55   :  { %821 = vmatpush.bf16.msrb.mxu2 %v1793_v5  ;;  %v2636_v5 = vld [vmem:[#allocation5 + $0x2d4] sm:$0xf]  ;;  %v2126_v28 = vld [vmem:[#allocation5 + $0x2b8] sm:$0xf0]  ;;  %v2630_v42 = vld [vmem:[#allocation5 + $0x2a4] sm:$0xf] }
  0x56   :  { %839 = vmatpush.bf16.msrb.mxu3 %v1857_v20  ;;  %v2145_v13 = vor.u32 %v2636_v5, %v2142_v6  ;;  %v2062_v20 = vld [vmem:[#allocation5 + $0x238] sm:$0xf0]  ;;  %v2612_v49 = vld [vmem:[#allocation5 + $0x214] sm:$0xf]  ;;  %v2610_v3 = vld [vmem:[#allocation5 + $0x204] sm:$0xf] }
  0x57   :  { %786 = vmatpush.bf16.msrb.mxu0 %v2037_v35  ;;  %v2065_v24 = vor.u32 %v2616_v19, %v2062_v20  ;;  %v2582_v35 = vld [vmem:[#allocation5 + $0x124] sm:$0xf]  ;;  %v2046_v51 = vld [vmem:[#allocation5 + $0x218] sm:$0xf0]  ;;  %v2580_v59 = vld [vmem:[#allocation5 + $0x114] sm:$0xf] }
  0x58   :  { %804 = vmatpush.bf16.msrb.mxu1 %v2101_v25  ;;  %v2600_v25 = vld [vmem:[#allocation5 + $0x1b4] sm:$0xf]  ;;  %v1929_v52 = vor.u32 %v2582_v35, %v1926_v36  ;;  %v1918_v60 = vld [vmem:[#allocation5 + $0x118] sm:$0xf0]  ;;  %v2038_v4 = vld [vmem:[#allocation5 + $0x208] sm:$0xf0] }
  0x59   :  { %822 = vmatpush.bf16.msrb.mxu2 %v1785_v21  ;;  %v2584_v21 = vld [vmem:[#allocation5 + $0x134] sm:$0xf]  ;;  %v2001_v34 = vor.u32 %v2600_v25, %v1998_v26  ;;  %v1982_v0 = vld [vmem:[#allocation5 + $0x198] sm:$0xf0]  ;;  %v1921_v5 = vor.u32 %v2580_v59, %v1918_v60  ;;  %v2578_v7 = vld [vmem:[#allocation5 + $0x104] sm:$0xf] }
  0x5a   :  { %840 = vmatpush.bf16.msrb.mxu3 %v1849_v39  ;;  %787 = vmatmul.bf16.vlgmr.msrb.gmra.mxu0 %v2986_v55  ;;  %v1937_v33 = vor.u32 %v2584_v21, %v1934_v22  ;;  %v2598_v39 = vld [vmem:[#allocation5 + $0x1a4] sm:$0xf]  ;;  %v2596_v63 = vld [vmem:[#allocation5 + $0x194] sm:$0xf]  ;;  %v2687_v17 = vld [vmem:[#allocation8 + $0x164] sm:$0xf0] }
  0x5b   :  { %851 = vmatpush.bf16.msra.mxu0 %v1969_v41  ;;  %805 = vmatmul.bf16.vlgmr.msrb.gmra.mxu1 %v2988_v56  ;;  %v1990_v41 = vld [vmem:[#allocation5 + $0x1a8] sm:$0xf0]  ;;  %v1985_v6 = vor.u32 %v2596_v63, %v1982_v0  ;;  %v2684_v18 = vld [vmem:[#allocation8 + $0x154] sm:$0xf]  ;;  %v2310_v21 = vld [vmem:[#allocation8 + $0x138] sm:$0xf0] }
  0x5c   :  { %869 = vmatpush.bf16.msra.mxu1 %v2033_v31  ;;  %823 = vmatmul.bf16.vlgmr.msrb.gmra.mxu2 %v2962_v48  ;;  %v1945_v48 = vor.u32 %v2586_v11, %v1942_v12  ;;  %v111_v31 = vld [vmem:[#allocation2 + $0x80] sm:$0xf]  ;;  %v1993_v58 = vor.u32 %v2598_v39, %v1990_v41  ;;  %v2594_v11 = vld [vmem:[#allocation5 + $0x184] sm:$0xf]  ;;  %v1974_v12 = vld [vmem:[#allocation5 + $0x188] sm:$0xf0] }
  0x5d   :  { %887 = vmatpush.bf16.msra.mxu2 %v2097_v27  ;;  %841 = vmatmul.bf16.vlgmr.msrb.gmra.mxu3 %v2964_v53  ;;  %v2009_v53 = vor.u32 %v2602_v15, %v2006_v16  ;;  %v2632_v27 = vld [vmem:[#allocation5 + $0x2b4] sm:$0xf]  ;;  %v123_v43 = vpack.c.bf16 %v111_v31, %v111_v31  ;;  %v2334_v20 = vld [vmem:[#allocation8 + $0x168] sm:$0xf0]  ;;  %v2260_v26 = vld [vmem:[#allocation8 + $0xc0] sm:$0xf] }
  0x5e   :  { %905 = vmatpush.bf16.msra.mxu3 %v2161_v44  ;;  %v2129_v37 = vor.u32 %v2632_v27, %v2126_v28  ;;  %v124_v44 = vpack.c.bf16 %v112_v32, %v112_v32  ;;  %v2332_v16 = vld [vmem:[#allocation8 + $0x150] sm:$0xf]  ;;  %v2672_v22 = vld [vmem:[#allocation8 + $0xf4] sm:$0xf]  ;;  %v2669_v27 = vld [vmem:[#allocation8 + $0xd4] sm:$0xf0] }
  0x5f   :  { %852 = vmatpush.bf16.msra.mxu0 %v1961_v61  ;;  %v2333_v19 = vor.u32 %v2687_v17, %v2332_v16  ;;  %v2666_v28 = vld [vmem:[#allocation8 + $0xc4] sm:$0xf]  ;;  %v2261_v29 = vor.u32 %v2669_v27, %v2260_v26  ;;  %v2262_v30 = vld [vmem:[#allocation8 + $0xd8] sm:$0xf0]  ;;  %v2663_v35 = vld [vmem:[#allocation8 + $0xa4] sm:$0xf0] }
  0x60   :  { %870 = vmatpush.bf16.msra.mxu1 %v2025_v62  ;;  %v2049_v62 = vor.u32 %v2612_v49, %v2046_v51  ;;  %v2265_v31 = vor.u32 %v2666_v28, %v2262_v30  ;;  %v2660_v36 = vld [vmem:[#allocation8 + $0x94] sm:$0xf]  ;;  %v2212_v41 = vld [vmem:[#allocation8 + $0x60] sm:$0xf]  ;;  %v2188_v60 = vld [vmem:[#allocation8 + $0x30] sm:$0xf] }
  0x61   :  { %888 = vmatpush.bf16.msra.mxu2 %v2089_v47  ;;  %v2118_v47 = vld [vmem:[#allocation5 + $0x2a8] sm:$0xf0]  ;;  %v2292_v27 = vld [vmem:[#allocation8 + $0xf8] sm:$0xf]  ;;  %v2676_v28 = vld [vmem:[#allocation8 + $0x10c] sm:$0xf0] }
  0x62   :  { %906 = vmatpush.bf16.msra.mxu3 %v2153_v1  ;;  %v2121_v61 = vor.u32 %v2630_v42, %v2118_v47  ;;  %v2628_v1 = vld [vmem:[#allocation5 + $0x294] sm:$0xf]  ;;  %v2657_v42 = vld [vmem:[#allocation8 + $0x74] sm:$0xf0]  ;;  %v2214_v47 = vld [vmem:[#allocation8 + $0x78] sm:$0xf0]  ;;  %v2293_v30 = vor.u32 %v2676_v28, %v2292_v27 }
  0x63   :  { %853 = vmatpush.bf16.msra.mxu0 %v1953_v9  ;;  %v2041_v9 = vor.u32 %v2610_v3, %v2038_v4  ;;  %v2190_v0 = vld [vmem:[#allocation8 + $0x48] sm:$0xf0]  ;;  %v2645_v3 = vld [vmem:[#allocation8 + $0x14] sm:$0xf0]  ;;  %v2642_v4 = vld [vmem:[#allocation8 + $0x4] sm:$0xf] }
  0x64   :  { %871 = vmatpush.bf16.msra.mxu1 %v2017_v10  ;;  %v1910_v10 = vld [vmem:[#allocation5 + $0x108] sm:$0xf0] }
  0x65   :  { %889 = vmatpush.bf16.msra.mxu2 %v2081_v2  ;;  %v2110_v2 = vld [vmem:[#allocation5 + $0x298] sm:$0xf0]  ;;  %v1913_v15 = vor.u32 %v2578_v7, %v1910_v10 }
  0x66   :  { %907 = vmatpush.bf16.msra.mxu3 %v2145_v13  ;;  %v2113_v8 = vor.u32 %v2628_v1, %v2110_v2  ;;  %v2626_v13 = vld [vmem:[#allocation5 + $0x284] sm:$0xf] }
  0x67   :  { %854 = vmatpush.bf16.msra.mxu0 %v1945_v48  ;;  %v2337_v48 = vor.u32 %v2684_v18, %v2334_v20  ;;  %v2164_v2 = vld [vmem:[#allocation8] sm:$0xf]  ;;  %v2316_v18 = vld [vmem:[#allocation8 + $0x128] sm:$0xf]  ;;  %v2679_v20 = vld [vmem:[#allocation8 + $0x12c] sm:$0xf] }
  0x68   :  { %872 = vmatpush.bf16.msra.mxu1 %v2009_v53  ;;  %v2678_v53 = vld [vmem:[#allocation8 + $0x124] sm:$0xf] }
  0x69   :  { %890 = vmatpush.bf16.msra.mxu2 %v2073_v14  ;;  %v2102_v14 = vld [vmem:[#allocation5 + $0x288] sm:$0xf0] }
  0x6a   :  { %908 = vmatpush.bf16.msra.mxu3 %v2137_v23  ;;  %792 = vmatmul.bf16.gmra.mxu0 %v123_v43 }
  0x6b   :  { %855 = vmatpush.bf16.msra.mxu0 %v1937_v33  ;;  %810 = vmatmul.bf16.gmra.mxu1 %v124_v44 }
  0x6c   :  { %873 = vmatpush.bf16.msra.mxu1 %v2001_v34  ;;  %828 = vmatmul.bf16.gmra.mxu2 %v2974_v40  ;;  %v1977_v40 = vor.u32 %v2594_v11, %v1974_v12  ;;  %v2236_v34 = vld [vmem:[#allocation8 + $0x90] sm:$0xf] }
  0x6d   :  { %891 = vmatpush.bf16.msra.mxu2 %v2065_v24  ;;  %846 = vmatmul.bf16.gmra.mxu3 %v2976_v45  ;;  %v2105_v45 = vor.u32 %v2626_v13, %v2102_v14  ;;  %v2286_v24 = vld [vmem:[#allocation8 + $0x108] sm:$0xf0]  ;;  %v2340_v13 = vld [vmem:[#allocation8 + $0x158] sm:$0xf]  ;;  %v2688_v14 = vld [vmem:[#allocation8 + $0x16c] sm:$0xf0] }
  0x6e   :  { %909 = vmatpush.bf16.msra.mxu3 %v2129_v37  ;;  %v2289_v25 = vor.u32 %v2672_v22, %v2286_v24  ;;  %v2237_v37 = vor.u32 %v2663_v35, %v2236_v34  ;;  %v2735_v24 = vld [vmem:[#allocation8 + $0x2e4] sm:$0xf0]  ;;  %v2726_v35 = vld [vmem:[#allocation8 + $0x2a4] sm:$0xf] }
  0x6f   :  { %856 = vmatpush.bf16.msra.mxu0 %v1929_v52 }
  0x70   :  { %874 = vmatpush.bf16.msra.mxu1 %v1993_v58 }
  0x71   :  { %892 = vmatpush.bf16.msra.mxu2 %v2057_v38  ;;  %v2238_v38 = vld [vmem:[#allocation8 + $0xa8] sm:$0xf0] }
  0x72   :  { %910 = vmatpush.bf16.msra.mxu3 %v2121_v61  ;;  %v2241_v39 = vor.u32 %v2660_v36, %v2238_v38  ;;  %v2651_v61 = vld [vmem:[#allocation8 + $0x44] sm:$0xf0]  ;;  %v2502_v36 = vld [vmem:[#allocation8 + $0x2b8] sm:$0xf0] }
  0x73   :  { %857 = vmatpush.bf16.msra.mxu0 %v1921_v5  ;;  %v2189_v63 = vor.u32 %v2651_v61, %v2188_v60  ;;  %v2165_v5 = vor.u32 %v2645_v3, %v2164_v2  ;;  %v2505_v38 = vor.u32 %v2726_v35, %v2502_v36  ;;  %v2270_v60 = vld [vmem:[#allocation8 + $0xe0] sm:$0xf0]  ;;  %v2196_v35 = vld [vmem:[#allocation8 + $0x38] sm:$0xf]  ;;  %v2652_v36 = vld [vmem:[#allocation8 + $0x4c] sm:$0xf0] }
  0x74   :  { %875 = vmatpush.bf16.msra.mxu1 %v1985_v6  ;;  %v2166_v6 = vld [vmem:[#allocation8 + $0x18] sm:$0xf0] }
  0x75   :  { %893 = vmatpush.bf16.msra.mxu2 %v2049_v62  ;;  %v2648_v62 = vld [vmem:[#allocation8 + $0x34] sm:$0xf] }
  0x76   :  { %911 = vmatpush.bf16.msra.mxu3 %v2113_v8  ;;  %v2193_v1 = vor.u32 %v2648_v62, %v2190_v0  ;;  %v2169_v8 = vor.u32 %v2642_v4, %v2166_v6  ;;  %v2478_v0 = vld [vmem:[#allocation8 + $0x288] sm:$0xf0]  ;;  %v2723_v4 = vld [vmem:[#allocation8 + $0x284] sm:$0xf0] }
  0x77   :  { %858 = vmatpush.bf16.msra.mxu0 %v1913_v15  ;;  %v2685_v15 = vld [vmem:[#allocation8 + $0x15c] sm:$0xf] }
  0x78   :  { %876 = vmatpush.bf16.msra.mxu1 %v1977_v40  ;;  %v2341_v40 = vor.u32 %v2688_v14, %v2340_v13  ;;  %v2664_v13 = vld [vmem:[#allocation8 + $0xac] sm:$0xf0]  ;;  %v2661_v14 = vld [vmem:[#allocation8 + $0x9c] sm:$0xf] }
  0x79   :  { %894 = vmatpush.bf16.msra.mxu2 %v2041_v9  ;;  %v3016_v9 = vld [vmem:[#allocation7] sm:$0x3] }
  0x7a   :  { %912 = vmatpush.bf16.msra.mxu3 %v2105_v45  ;;  %859 = vmatmul.bf16.vlgmr.msra.gmra.mxu0 %v2966_v54  ;;  %v2308_v54 = vld [vmem:[#allocation8 + $0x120] sm:$0xf]  ;;  %v2342_v45 = vld [vmem:[#allocation8 + $0x170] sm:$0xf0]  ;;  %v3025_v17 = vperm.slane %v3016_v9, 0 }
  0x7b   :  { %877 = vmatmul.bf16.vlgmr.msra.gmra.mxu1 %v2968_v57  ;;  %1523 = vmatpush.bf16.msrb.mxu0 %v2333_v19  ;;  %v2681_v57 = vld [vmem:[#allocation8 + $0x134] sm:$0xf0]  ;;  %v2345_v16 = vor.u32 %v2685_v15, %v2342_v45  ;;  %v2682_v19 = vld [vmem:[#allocation8 + $0x13c] sm:$0xf0]  ;;  %v2246_v45 = vld [vmem:[#allocation8 + $0xb0] sm:$0xf0] }
  0x7c   :  { %895 = vmatmul.bf16.vlgmr.msra.gmra.mxu2 %v2986_v55  ;;  %v2309_v55 = vor.u32 %v2681_v57, %v2308_v54  ;;  %v2318_v54 = vld [vmem:[#allocation8 + $0x140] sm:$0xf0] }
  0x7d   :  { %913 = vmatmul.bf16.vlgmr.msra.gmra.mxu3 %v2988_v56  ;;  %1559 = vmatpush.bf16.msrb.mxu2 %v2337_v48  ;;  %v2313_v56 = vor.u32 %v2678_v53, %v2310_v21  ;;  %v2317_v48 = vor.u32 %v2682_v19, %v2316_v18  ;;  %v2321_v53 = vor.u32 %v2679_v20, %v2318_v54  ;;  %v2526_v21 = vld [vmem:[#allocation8 + $0x2e8] sm:$0xf0]  ;;  %v2714_v18 = vld [vmem:[#allocation8 + $0x244] sm:$0xf]  ;;  %v2452_v19 = vld [vmem:[#allocation8 + $0x240] sm:$0xf] }
  0x7f   :  { %1524 = vmatpush.bf16.msrb.mxu0 %v2309_v55  ;;  %v2732_v55 = vld [vmem:[#allocation8 + $0x2d4] sm:$0xf] }
  0x81   :  { %1560 = vmatpush.bf16.msrb.mxu2 %v2313_v56  ;;  %v2524_v56 = vld [vmem:[#allocation8 + $0x2d0] sm:$0xf] }
  0x82   :  { %v2525_v26 = vor.u32 %v2735_v24, %v2524_v56  ;;  %v2658_v56 = vld [vmem:[#allocation8 + $0x7c] sm:$0xf0]  ;;  %v2222_v24 = vld [vmem:[#allocation8 + $0x80] sm:$0xf0] }
  0x84   :  { %1541 = vmatpush.bf16.msrb.mxu1 %v2525_v26  ;;  %v2430_v26 = vld [vmem:[#allocation8 + $0x228] sm:$0xf0] }
  0x85   :  { %1561 = vmatpush.bf16.msrb.mxu2 %v2289_v25 }
  0x89   :  { %1562 = vmatpush.bf16.msrb.mxu2 %v2265_v31  ;;  %v2294_v31 = vld [vmem:[#allocation8 + $0x110] sm:$0xf0] }
  0x8a   :  { %864 = vmatmul.bf16.gmra.mxu0 %v2978_v46  ;;  %v2284_v46 = vld [vmem:[#allocation8 + $0xf0] sm:$0xf] }
  0x8b   :  { %882 = vmatmul.bf16.gmra.mxu1 %v2980_v50  ;;  %v2675_v50 = vld [vmem:[#allocation8 + $0x104] sm:$0xf0] }
  0x8c   :  { %900 = vmatmul.bf16.gmra.mxu2 %v123_v43  ;;  %v2285_v23 = vor.u32 %v2675_v50, %v2284_v46  ;;  %v2654_v43 = vld [vmem:[#allocation8 + $0x64] sm:$0xf] }
  0x8d   :  { %918 = vmatmul.bf16.gmra.mxu3 %v124_v44  ;;  %1563 = vmatpush.bf16.msrb.mxu2 %v2241_v39  ;;  %v2213_v44 = vor.u32 %v2657_v42, %v2212_v41  ;;  %v2217_v51 = vor.u32 %v2654_v43, %v2214_v47  ;;  %v2729_v39 = vld [vmem:[#allocation8 + $0x2b4] sm:$0xf0]  ;;  %v2268_v42 = vld [vmem:[#allocation8 + $0xc8] sm:$0xf]  ;;  %v2670_v43 = vld [vmem:[#allocation8 + $0xdc] sm:$0xf0] }
  0x8e   :  { %1525 = vmatpush.bf16.msrb.mxu0 %v2285_v23  ;;  %v2529_v23 = vor.u32 %v2732_v55, %v2526_v21  ;;  %v2220_v21 = vld [vmem:[#allocation8 + $0x68] sm:$0xf] }
  0x90   :  { %1577 = vmatpush.bf16.msrb.mxu3 %v2529_v23  ;;  %v2221_v23 = vor.u32 %v2658_v56, %v2220_v21  ;;  %v2690_v21 = vld [vmem:[#allocation8 + $0x184] sm:$0xf]  ;;  %v2358_v56 = vld [vmem:[#allocation8 + $0x198] sm:$0xf0] }
  0x91   :  { %1564 = vmatpush.bf16.msrb.mxu2 %v2217_v51  ;;  %v2269_v51 = vor.u32 %v2670_v43, %v2268_v42  ;;  %v2702_v43 = vld [vmem:[#allocation8 + $0x1e4] sm:$0xf] }
  0x92   :  { %1526 = vmatpush.bf16.msrb.mxu0 %v2261_v29  ;;  %v2673_v29 = vld [vmem:[#allocation8 + $0xfc] sm:$0xf] }
  0x93   :  { %v2297_v34 = vor.u32 %v2673_v29, %v2294_v31  ;;  %v2711_v31 = vld [vmem:[#allocation8 + $0x224] sm:$0xf0] }
  0x94   :  { %1578 = vmatpush.bf16.msrb.mxu3 %v2505_v38 }
  0x95   :  { %1565 = vmatpush.bf16.msrb.mxu2 %v2193_v1 }
  0x96   :  { %1527 = vmatpush.bf16.msrb.mxu0 %v2237_v37 }
  0x99   :  { %1566 = vmatpush.bf16.msrb.mxu2 %v2169_v8 }
  0x9a   :  { %1528 = vmatpush.bf16.msrb.mxu0 %v2213_v44  ;;  %v2667_v44 = vld [vmem:[#allocation8 + $0xcc] sm:$0xf] }
  0x9b   :  { %v2273_v62 = vor.u32 %v2667_v44, %v2270_v60  ;;  %v2406_v44 = vld [vmem:[#allocation8 + $0x1f8] sm:$0xf0] }
  0x9c   :  { %v2409_v60 = vor.u32 %v2702_v43, %v2406_v44  ;;  %v2302_v44 = vld [vmem:[#allocation8 + $0x118] sm:$0xf0] }
  0x9d   :  { %1631 = vmatpush.bf16.msra.mxu2 %v2345_v16  ;;  %v2249_v16 = vor.u32 %v2661_v14, %v2246_v45  ;;  %v2699_v45 = vld [vmem:[#allocation8 + $0x1c4] sm:$0xf0] }
  0x9e   :  { %1529 = vmatpush.bf16.msrb.mxu0 %v2189_v63  ;;  %v2720_v63 = vld [vmem:[#allocation8 + $0x274] sm:$0xf] }
  0x9f   :  { %v2481_v3 = vor.u32 %v2720_v63, %v2478_v0  ;;  %v2172_v63 = vld [vmem:[#allocation8 + $0x8] sm:$0xf]  ;;  %v2646_v0 = vld [vmem:[#allocation8 + $0x1c] sm:$0xf0] }
  0xa1   :  { %1632 = vmatpush.bf16.msra.mxu2 %v2321_v53  ;;  %1579 = vmatpush.bf16.msrb.mxu3 %v2481_v3  ;;  %v2717_v53 = vld [vmem:[#allocation8 + $0x254] sm:$0xf0]  ;;  %v2173_v3 = vor.u32 %v2646_v0, %v2172_v63 }
  0xa2   :  { %1530 = vmatpush.bf16.msrb.mxu0 %v2165_v5  ;;  %v2453_v55 = vor.u32 %v2717_v53, %v2452_v19  ;;  %v2689_v19 = vld [vmem:[#allocation8 + $0x174] sm:$0xf0]  ;;  %v2350_v53 = vld [vmem:[#allocation8 + $0x178] sm:$0xf0] }
  0xa5   :  { %1633 = vmatpush.bf16.msra.mxu2 %v2297_v34 }
  0xa6   :  { %1595 = vmatpush.bf16.msra.mxu0 %v2341_v40 }
  0xa9   :  { %1634 = vmatpush.bf16.msra.mxu2 %v2273_v62 }
  0xaa   :  { %1596 = vmatpush.bf16.msra.mxu0 %v2317_v48 }
  0xad   :  { %1635 = vmatpush.bf16.msra.mxu2 %v2249_v16 }
  0xae   :  { %1597 = vmatpush.bf16.msra.mxu0 %v2293_v30 }
  0xb2   :  { %1598 = vmatpush.bf16.msra.mxu0 %v2269_v51 }
  0xb7   :  { %v3002_v32 = vpop.f32.mrf.mxu0 }
  0xb8   :  { %v3004_v33 = vpop.f32.mrf.mxu1  ;;  %v717_v46 = vadd.f32 %v3002_v32, %v3025_v17  ;;  %v2500_v32 = vld [vmem:[#allocation8 + $0x2a0] sm:$0xf] }
  0xb9   :  { %v2501_v41 = vor.u32 %v2729_v39, %v2500_v32  ;;  %v2649_v32 = vld [vmem:[#allocation8 + $0x3c] sm:$0xf] }
  0xba   :  { %v735_v37 = vadd.f32 %v3004_v33, %v717_v46  ;;  %v2476_v33 = vld [vmem:[#allocation8 + $0x270] sm:$0xf] }
  0xbb   :  { %1542 = vmatpush.bf16.msrb.mxu1 %v2501_v41  ;;  %v2477_v8 = vor.u32 %v2723_v4, %v2476_v33  ;;  %v2198_v41 = vld [vmem:[#allocation8 + $0x50] sm:$0xf0]  ;;  %v2643_v33 = vld [vmem:[#allocation8 + $0xc] sm:$0xf]  ;;  %v2174_v4 = vld [vmem:[#allocation8 + $0x20] sm:$0xf0] }
  0xbc   :  { %v2201_v42 = vor.u32 %v2649_v32, %v2198_v41  ;;  %v2736_v32 = vld [vmem:[#allocation8 + $0x2ec] sm:$0xf0]  ;;  %v2677_v41 = vld [vmem:[#allocation8 + $0x114] sm:$0xf0] }
  0xbf   :  { %v3006_v49 = vpop.f32.mrf.mxu2  ;;  %v3010_v58 = vpop.f32.mrf.mxu0  ;;  %1543 = vmatpush.bf16.msrb.mxu1 %v2477_v8  ;;  %v2382_v8 = vld [vmem:[#allocation8 + $0x1c8] sm:$0xf0] }
  0xc0   :  { %v3008_v52 = vpop.f32.mrf.mxu3  ;;  %v3012_v59 = vpop.f32.mrf.mxu1  ;;  %v719_v47 = vadd.f32 %v3010_v58, %v3025_v17  ;;  %v753_v1 = vadd.f32 %v3006_v49, %v735_v37  ;;  %v2244_v58 = vld [vmem:[#allocation8 + $0x98] sm:$0xf]  ;;  %v2454_v49 = vld [vmem:[#allocation8 + $0x258] sm:$0xf0] }
  0xc1   :  { %v2245_v40 = vor.u32 %v2664_v13, %v2244_v58  ;;  %v2457_v54 = vor.u32 %v2714_v18, %v2454_v49  ;;  %v2380_v58 = vld [vmem:[#allocation8 + $0x1b0] sm:$0xf]  ;;  %v2348_v49 = vld [vmem:[#allocation8 + $0x160] sm:$0xf] }
  0xc2   :  { %v737_v15 = vadd.f32 %v3012_v59, %v719_v47  ;;  %v771_v20 = vadd.f32 %v3008_v52, %v753_v1  ;;  %v2655_v59 = vld [vmem:[#allocation8 + $0x6c] sm:$0xf]  ;;  %v2708_v52 = vld [vmem:[#allocation8 + $0x214] sm:$0xf]  ;;  %v2404_v47 = vld [vmem:[#allocation8 + $0x1e0] sm:$0xf]  ;;  %v2381_v18 = vor.u32 %v2699_v45, %v2380_v58 }
  0xc3   :  { %1599 = vmatpush.bf16.msra.mxu0 %v2245_v40  ;;  %1580 = vmatpush.bf16.msrb.mxu3 %v2457_v54  ;;  %v2433_v30 = vor.u32 %v2708_v52, %v2430_v26  ;;  %v2349_v54 = vor.u32 %v2689_v19, %v2348_v49  ;;  %v2680_v52 = vld [vmem:[#allocation8 + $0x134] sm:$0xf]  ;;  %v2724_v49 = vld [vmem:[#allocation8 + $0x28c] sm:$0xf0] }
  0xc4   :  { %1544 = vmatpush.bf16.msrb.mxu1 %v2453_v55  ;;  %v2486_v58 = vld [vmem:[#allocation8 + $0x290] sm:$0xf0] }
  0xc7   :  { %v3014_v7 = vpop.f32.mrf.mxu2  ;;  %v3020_v11 = vpop.f32.mrf.mxu0  ;;  %1600 = vmatpush.bf16.msra.mxu0 %v2221_v23  ;;  %1581 = vmatpush.bf16.msrb.mxu3 %v2433_v30  ;;  %v2693_v23 = vld [vmem:[#allocation8 + $0x194] sm:$0xf0]  ;;  %v2733_v30 = vld [vmem:[#allocation8 + $0x2dc] sm:$0xf] }
  0xc8   :  { %v3018_v10 = vpop.f32.mrf.mxu3  ;;  %v3022_v12 = vpop.f32.mrf.mxu1  ;;  %v755_v48 = vadd.f32 %v3014_v7, %v737_v15  ;;  %v722_v46 = vadd.f32 %v3020_v11, %v3025_v17  ;;  %v2428_v7 = vld [vmem:[#allocation8 + $0x210] sm:$0xf] }
  0xc9   :  { %v2429_v17 = vor.u32 %v2711_v31, %v2428_v7  ;;  %v2326_v7 = vld [vmem:[#allocation8 + $0x148] sm:$0xf0]  ;;  %v2534_v31 = vld [vmem:[#allocation8 + $0x2f0] sm:$0xf0] }
  0xca   :  { %v773_v27 = vadd.f32 %v3018_v10, %v755_v48  ;;  %v740_v37 = vadd.f32 %v3022_v12, %v722_v46  ;;  %v2197_v10 = vor.u32 %v2652_v36, %v2196_v35  ;;  %v2537_v36 = vor.u32 %v2733_v30, %v2534_v31 }
  0xcb   :  { %1545 = vmatpush.bf16.msrb.mxu1 %v2429_v17  ;;  %1582 = vmatpush.bf16.msrb.mxu3 %v2409_v60  ;;  %v2510_v60 = vld [vmem:[#allocation8 + $0x2c0] sm:$0xf0] }
  0xcc   :  { %1601 = vmatpush.bf16.msra.mxu0 %v2197_v10  ;;  %v2300_v10 = vld [vmem:[#allocation8 + $0x100] sm:$0xf] }
  0xcd   :  { %v2301_v43 = vor.u32 %v2677_v41, %v2300_v10  ;;  %v2712_v10 = vld [vmem:[#allocation8 + $0x22c] sm:$0xf0] }
  0xcf   :  { %v3027_v57 = vpop.f32.mrf.mxu2  ;;  %v723_v22 = vpop.f32.mrf.mxu0 }
  0xd0   :  { %v3031_v50 = vpop.f32.mrf.mxu3  ;;  %v741_v25 = vpop.f32.mrf.mxu1  ;;  %v758_v12 = vadd.f32 %v3027_v57, %v740_v37  ;;  %1602 = vmatpush.bf16.msra.mxu0 %v2173_v3  ;;  %v2668_v3 = vld [vmem:[#allocation8 + $0xd4] sm:$0xf] }
  0xd1   :  { %v2225_v25 = vor.u32 %v2655_v59, %v2222_v24  ;;  %v2356_v59 = vld [vmem:[#allocation8 + $0x180] sm:$0xf] }
  0xd2   :  { %v776_v48 = vadd.f32 %v3031_v50, %v758_v12  ;;  %v2357_v24 = vor.u32 %v2693_v23, %v2356_v59  ;;  %v2683_v50 = vld [vmem:[#allocation8 + $0x144] sm:$0xf0]  ;;  %v2462_v59 = vld [vmem:[#allocation8 + $0x260] sm:$0xf0] }
  0xd3   :  { %1636 = vmatpush.bf16.msra.mxu2 %v2225_v25  ;;  %v2324_v25 = vld [vmem:[#allocation8 + $0x130] sm:$0xf]  ;;  %v2460_v23 = vld [vmem:[#allocation8 + $0x248] sm:$0xf] }
  0xd4   :  { %v2325_v26 = vor.u32 %v2683_v50, %v2324_v25  ;;  %v2228_v25 = vld [vmem:[#allocation8 + $0x70] sm:$0xf] }
  0xd7   :  { %v759_v61 = vpop.f32.mrf.mxu2  ;;  %v788_v5 = vpop.f32.mrf.mxu0  ;;  %1637 = vmatpush.bf16.msra.mxu2 %v2201_v42  ;;  %v2674_v42 = vld [vmem:[#allocation8 + $0x104] sm:$0xf] }
  0xd8   :  { %v777_v2 = vpop.f32.mrf.mxu3  ;;  %v806_v6 = vpop.f32.mrf.mxu1  ;;  %v789_v22 = vadd.f32 %v788_v5, %v771_v20  ;;  %v2705_v61 = vld [vmem:[#allocation8 + $0x1f4] sm:$0xf0]  ;;  %v2177_v5 = vor.u32 %v2643_v33, %v2174_v4  ;;  %v2686_v20 = vld [vmem:[#allocation8 + $0x164] sm:$0xf]  ;;  %v2730_v33 = vld [vmem:[#allocation8 + $0x2bc] sm:$0xf0] }
  0xd9   :  { %v2405_v62 = vor.u32 %v2705_v61, %v2404_v47  ;;  %v2353_v55 = vor.u32 %v2686_v20, %v2350_v53  ;;  %v2305_v47 = vor.u32 %v2674_v42, %v2302_v44  ;;  %v2508_v61 = vld [vmem:[#allocation8 + $0x2a8] sm:$0xf]  ;;  %v2665_v53 = vld [vmem:[#allocation8 + $0xb4] sm:$0xf0]  ;;  %v2204_v44 = vld [vmem:[#allocation8 + $0x40] sm:$0xf] }
  0xda   :  { %v807_v38 = vadd.f32 %v806_v6, %v789_v22  ;;  %v2696_v6 = vld [vmem:[#allocation8 + $0x1b4] sm:$0xf]  ;;  %v2361_v22 = vor.u32 %v2690_v21, %v2358_v56  ;;  %v2509_v12 = vor.u32 %v2730_v33, %v2508_v61  ;;  %v2715_v56 = vld [vmem:[#allocation8 + $0x24c] sm:$0xf]  ;;  %v2414_v33 = vld [vmem:[#allocation8 + $0x200] sm:$0xf0] }
  0xdb   :  { %1546 = vmatpush.bf16.msrb.mxu1 %v2405_v62  ;;  %v2385_v40 = vor.u32 %v2696_v6, %v2382_v8  ;;  %1638 = vmatpush.bf16.msra.mxu2 %v2177_v5  ;;  %v3063_v62 = vperm.slane %v3016_v9, 1  ;;  %v2278_v5 = vld [vmem:[#allocation8 + $0xe8] sm:$0xf0]  ;;  %v2721_v8 = vld [vmem:[#allocation8 + $0x27c] sm:$0xf] }
  0xdc   :  { %v923_v1 = vmax.f32 %v807_v38, 0.0  ;;  %v2281_v6 = vor.u32 %v2668_v3, %v2278_v5  ;;  %v2412_v3 = vld [vmem:[#allocation8 + $0x1e8] sm:$0xf] }
  0xdd   :  { %1583 = vmatpush.bf16.msrb.mxu3 %v2385_v40  ;;  %v2484_v40 = vld [vmem:[#allocation8 + $0x278] sm:$0xf] }
  0xdf   :  { %v3043_v28 = vpop.f32.mrf.mxu2  ;;  %v790_v34 = vpop.f32.mrf.mxu0  ;;  %1547 = vmatpush.bf16.msrb.mxu1 %v2381_v18  ;;  %v2489_v18 = vor.u32 %v2721_v8, %v2486_v58  ;;  %v2644_v8 = vld [vmem:[#allocation8 + $0x14] sm:$0xf]  ;;  %v2182_v58 = vld [vmem:[#allocation8 + $0x28] sm:$0xf0] }
  0xe0   :  { %v3045_v29 = vpop.f32.mrf.mxu3  ;;  %v808_v11 = vpop.f32.mrf.mxu1  ;;  %v791_v39 = vadd.f32 %v790_v34, %v773_v27  ;;  %v2329_v27 = vor.u32 %v2680_v52, %v2326_v7  ;;  %v2532_v34 = vld [vmem:[#allocation8 + $0x2d8] sm:$0xf]  ;;  %v825_v9 = vadd.f32 %v3043_v28, %v3063_v62  ;;  %v2254_v28 = vld [vmem:[#allocation8 + $0xb8] sm:$0xf0]  ;;  %v2656_v7 = vld [vmem:[#allocation8 + $0x74] sm:$0xf] }
  0xe1   :  { %1584 = vmatpush.bf16.msrb.mxu3 %v2361_v22  ;;  %v2465_v22 = vor.u32 %v2715_v56, %v2462_v59 }
  0xe2   :  { %v809_v51 = vadd.f32 %v808_v11, %v791_v39  ;;  %v2533_v39 = vor.u32 %v2736_v32, %v2532_v34  ;;  %v843_v50 = vadd.f32 %v3045_v29, %v825_v9  ;;  %v2438_v32 = vld [vmem:[#allocation8 + $0x230] sm:$0xf0] }
  0xe3   :  { %1548 = vmatpush.bf16.msrb.mxu1 %v2357_v24  ;;  %v2718_v24 = vld [vmem:[#allocation8 + $0x25c] sm:$0xf0] }
  0xe4   :  { %v925_v2 = vmax.f32 %v809_v51, 0.0  ;;  %v2727_v51 = vld [vmem:[#allocation8 + $0x2ac] sm:$0xf]  ;;  %v2461_v52 = vor.u32 %v2718_v24, %v2460_v23 }
  0xe5   :  { %1649 = vmatpush.bf16.msra.mxu3 %v2537_v36  ;;  %v2513_v0 = vor.u32 %v2727_v51, %v2510_v60  ;;  %v2709_v36 = vld [vmem:[#allocation8 + $0x21c] sm:$0xf]  ;;  %v2650_v51 = vld [vmem:[#allocation8 + $0x44] sm:$0xf] }
  0xe6   :  { %v3049_v13 = vpack.c.bf16 %v925_v2, %v923_v1  ;;  %v2276_v1 = vld [vmem:[#allocation8 + $0xd0] sm:$0xf]  ;;  %v2671_v2 = vld [vmem:[#allocation8 + $0xe4] sm:$0xf0]  ;;  %v2441_v29 = vor.u32 %v2709_v36, %v2438_v32 }
  0xe7   :  { %v3051_v14 = vpop.f32.mrf.mxu2  ;;  %v793_v57 = vpop.f32.mrf.mxu0  ;;  %1613 = vmatpush.bf16.msra.mxu1 %v2533_v39  ;;  %v2277_v4 = vor.u32 %v2671_v2, %v2276_v1 }
  0xe8   :  { %v3053_v15 = vpop.f32.mrf.mxu3  ;;  %v811_v16 = vpop.f32.mrf.mxu1  ;;  %1531 = vmatmul.bf16.vlgmr.msrb.gmra.mxu0 %v3049_v13  ;;  %1567 = vmatmul.bf16.vlgmr.msrb.gmra.mxu2 %v3049_v13  ;;  %v794_v46 = vadd.f32 %v793_v57, %v776_v48  ;;  %v2485_v48 = vor.u32 %v2724_v49, %v2484_v40  ;;  %v827_v30 = vadd.f32 %v3051_v14, %v3063_v62 }
  0xe9   :  { %1667 = vmatpush.bf16.msrb.mxu0 %v2349_v54  ;;  %1703 = vmatpush.bf16.msrb.mxu2 %v2353_v55  ;;  %v2252_v54 = vld [vmem:[#allocation8 + $0xa0] sm:$0xf]  ;;  %v2662_v55 = vld [vmem:[#allocation8 + $0xa4] sm:$0xf] }
  0xea   :  { %v812_v11 = vadd.f32 %v811_v16, %v794_v46  ;;  %1650 = vmatpush.bf16.msra.mxu3 %v2513_v0  ;;  %v2253_v21 = vor.u32 %v2665_v53, %v2252_v54  ;;  %v2257_v46 = vor.u32 %v2662_v55, %v2254_v28  ;;  %v845_v41 = vadd.f32 %v3053_v15, %v827_v30  ;;  %v2703_v0 = vld [vmem:[#allocation8 + $0x1ec] sm:$0xf]  ;;  %v2180_v15 = vld [vmem:[#allocation8 + $0x10] sm:$0xf] }
  0xeb   :  { %1614 = vmatpush.bf16.msra.mxu1 %v2509_v12  ;;  %v2417_v2 = vor.u32 %v2703_v0, %v2414_v33  ;;  %v2725_v0 = vld [vmem:[#allocation8 + $0x294] sm:$0xf0] }
  0xec   :  { %v927_v63 = vmax.f32 %v812_v11, 0.0 }
  0xed   :  { %1668 = vmatpush.bf16.msrb.mxu0 %v2325_v26  ;;  %1704 = vmatpush.bf16.msrb.mxu2 %v2329_v27  ;;  %v2659_v26 = vld [vmem:[#allocation8 + $0x84] sm:$0xf0]  ;;  %v2230_v27 = vld [vmem:[#allocation8 + $0x88] sm:$0xf0] }
  0xee   :  { %v3067_v45 = vpack.c.bf16 %v927_v63, %v927_v63  ;;  %1651 = vmatpush.bf16.msra.mxu3 %v2489_v18  ;;  %v2229_v31 = vor.u32 %v2659_v26, %v2228_v25  ;;  %v2233_v34 = vor.u32 %v2656_v7, %v2230_v27  ;;  %v2206_v63 = vld [vmem:[#allocation8 + $0x58] sm:$0xf0]  ;;  %v2390_v18 = vld [vmem:[#allocation8 + $0x1d0] sm:$0xf0] }
  0xef   :  { %v3058_v17 = vpop.f32.mrf.mxu2  ;;  %v795_v37 = vpop.f32.mrf.mxu0  ;;  %1615 = vmatpush.bf16.msra.mxu1 %v2485_v48  ;;  %v2209_v1 = vor.u32 %v2650_v51, %v2206_v63  ;;  %v2492_v63 = vld [vmem:[#allocation8 + $0x280] sm:$0xf] }
  0xf0   :  { %v3060_v35 = vpop.f32.mrf.mxu3  ;;  %v813_v38 = vpop.f32.mrf.mxu1  ;;  %v2436_v37 = vld [vmem:[#allocation8 + $0x218] sm:$0xf]  ;;  %v830_v49 = vadd.f32 %v3058_v17, %v3063_v62  ;;  %v2691_v17 = vld [vmem:[#allocation8 + $0x18c] sm:$0xf]  ;;  %v2366_v62 = vld [vmem:[#allocation8 + $0x1a0] sm:$0xf0] }
  0xf1   :  { %1669 = vmatpush.bf16.msrb.mxu0 %v2301_v43  ;;  %1705 = vmatpush.bf16.msrb.mxu2 %v2305_v47  ;;  %v2437_v14 = vor.u32 %v2712_v10, %v2436_v37  ;;  %v2653_v47 = vld [vmem:[#allocation8 + $0x54] sm:$0xf0]  ;;  %v2369_v25 = vor.u32 %v2691_v17, %v2366_v62 }
  0xf2   :  { %1652 = vmatpush.bf16.msra.mxu3 %v2465_v22  ;;  %v2205_v61 = vor.u32 %v2653_v47, %v2204_v44  ;;  %v2364_v22 = vld [vmem:[#allocation8 + $0x188] sm:$0xf]  ;;  %v848_v23 = vadd.f32 %v3060_v35, %v830_v49  ;;  %v2737_v35 = vld [vmem:[#allocation8 + $0x2f4] sm:$0xf0] }
  0xf3   :  { %1616 = vmatpush.bf16.msra.mxu1 %v2461_v52  ;;  %v2731_v44 = vld [vmem:[#allocation8 + $0x2c4] sm:$0xf0]  ;;  %v2701_v17 = vld [vmem:[#allocation8 + $0x1d4] sm:$0xf0] }
  0xf5   :  { %1670 = vmatpush.bf16.msrb.mxu0 %v2277_v4  ;;  %1706 = vmatpush.bf16.msrb.mxu2 %v2281_v6  ;;  %v2706_v4 = vld [vmem:[#allocation8 + $0x1fc] sm:$0xf0]  ;;  %v2647_v6 = vld [vmem:[#allocation8 + $0x24] sm:$0xf0] }
  0xf6   :  { %1653 = vmatpush.bf16.msra.mxu3 %v2441_v29  ;;  %v2413_v5 = vor.u32 %v2706_v4, %v2412_v3  ;;  %v2181_v9 = vor.u32 %v2647_v6, %v2180_v15  ;;  %v2716_v4 = vld [vmem:[#allocation8 + $0x254] sm:$0xf]  ;;  %v2470_v15 = vld [vmem:[#allocation8 + $0x268] sm:$0xf0] }
  0xf7   :  { %v831_v57 = vpop.f32.mrf.mxu2  ;;  %v860_v19 = vpop.f32.mrf.mxu0  ;;  %1617 = vmatpush.bf16.msra.mxu1 %v2437_v14 }
  0xf8   :  { %v849_v16 = vpop.f32.mrf.mxu3  ;;  %v878_v20 = vpop.f32.mrf.mxu1  ;;  %1536 = vmatmul.bf16.gmra.mxu0 %v3067_v45  ;;  %1572 = vmatmul.bf16.gmra.mxu2 %v3067_v45  ;;  %v861_v11 = vadd.f32 %v860_v19, %v843_v50  ;;  %v2185_v57 = vor.u32 %v2644_v8, %v2182_v58  ;;  %v2388_v19 = vld [vmem:[#allocation8 + $0x1b8] sm:$0xf]  ;;  %v2694_v50 = vld [vmem:[#allocation8 + $0x19c] sm:$0xf0]  ;;  %v2473_v8 = vor.u32 %v2716_v4, %v2470_v15  ;;  %v2719_v58 = vld [vmem:[#allocation8 + $0x264] sm:$0xf0] }
  0xf9   :  { %1671 = vmatpush.bf16.msrb.mxu0 %v2253_v21  ;;  %1707 = vmatpush.bf16.msrb.mxu2 %v2257_v46  ;;  %v2697_v16 = vld [vmem:[#allocation8 + $0x1bc] sm:$0xf]  ;;  %v2365_v52 = vor.u32 %v2694_v50, %v2364_v22  ;;  %v2695_v50 = vld [vmem:[#allocation8 + $0x1a4] sm:$0xf0] }
  0xfa   :  { %v879_v60 = vadd.f32 %v878_v20, %v861_v11  ;;  %v2700_v20 = vld [vmem:[#allocation8 + $0x1cc] sm:$0xf0]  ;;  %1654 = vmatpush.bf16.msra.mxu3 %v2417_v2  ;;  %v2393_v54 = vor.u32 %v2697_v16, %v2390_v18  ;;  %v2540_v11 = vld [vmem:[#allocation8 + $0x2e0] sm:$0xf]  ;;  %v2446_v16 = vld [vmem:[#allocation8 + $0x238] sm:$0xf0] }
  0xfb   :  { %1618 = vmatpush.bf16.msra.mxu1 %v2413_v5  ;;  %v2389_v53 = vor.u32 %v2700_v20, %v2388_v19  ;;  %v2541_v10 = vor.u32 %v2737_v35, %v2540_v11  ;;  %v2468_v5 = vld [vmem:[#allocation8 + $0x250] sm:$0xf]  ;;  %v2444_v18 = vld [vmem:[#allocation8 + $0x220] sm:$0xf]  ;;  %v2713_v19 = vld [vmem:[#allocation8 + $0x234] sm:$0xf0] }
  0xfc   :  { %v2445_v20 = vor.u32 %v2713_v19, %v2444_v18 }
  0xfd   :  { %1672 = vmatpush.bf16.msrb.mxu0 %v2229_v31  ;;  %1708 = vmatpush.bf16.msrb.mxu2 %v2233_v34  ;;  %v2734_v31 = vld [vmem:[#allocation8 + $0x2e4] sm:$0xf]  ;;  %v2542_v34 = vld [vmem:[#allocation8 + $0x2f8] sm:$0xf0] }
  0xfe   :  { %1655 = vmatpush.bf16.msra.mxu3 %v2393_v54  ;;  %v2545_v37 = vor.u32 %v2734_v31, %v2542_v34  ;;  %v2422_v54 = vld [vmem:[#allocation8 + $0x208] sm:$0xf0] }
  0xff   :  { %v896_v38 = vpop.f32.mrf.mxu2  ;;  %v862_v42 = vpop.f32.mrf.mxu0  ;;  %1619 = vmatpush.bf16.msra.mxu1 %v2389_v53  ;;  %v2420_v53 = vld [vmem:[#allocation8 + $0x1f0] sm:$0xf] }
 0x100   :  { %v914_v39 = vpop.f32.mrf.mxu3  ;;  %v880_v43 = vpop.f32.mrf.mxu1  ;;  %v863_v12 = vadd.f32 %v862_v42, %v845_v41  ;;  %v897_v40 = vadd.f32 %v896_v38, %v879_v60  ;;  %v2728_v41 = vld [vmem:[#allocation8 + $0x2b4] sm:$0xf]  ;;  %v2518_v42 = vld [vmem:[#allocation8 + $0x2c8] sm:$0xf0]  ;;  %v2722_v60 = vld [vmem:[#allocation8 + $0x284] sm:$0xf] }
 0x101   :  { %1673 = vmatpush.bf16.msrb.mxu0 %v2205_v61  ;;  %1709 = vmatpush.bf16.msrb.mxu2 %v2209_v1  ;;  %v2521_v14 = vor.u32 %v2728_v41, %v2518_v42  ;;  %v2494_v61 = vld [vmem:[#allocation8 + $0x298] sm:$0xf0]  ;;  %v2493_v1 = vor.u32 %v2725_v0, %v2492_v63 }
 0x102   :  { %v881_v48 = vadd.f32 %v880_v43, %v863_v12  ;;  %v915_v28 = vadd.f32 %v914_v39, %v897_v40  ;;  %1656 = vmatpush.bf16.msra.mxu3 %v2369_v25  ;;  %v2516_v43 = vld [vmem:[#allocation8 + $0x2b0] sm:$0xf]  ;;  %v2497_v12 = vor.u32 %v2722_v60, %v2494_v61  ;;  %v2469_v40 = vor.u32 %v2719_v58, %v2468_v5 }
 0x103   :  { %1620 = vmatpush.bf16.msra.mxu1 %v2365_v52  ;;  %v2517_v51 = vor.u32 %v2731_v44, %v2516_v43  ;;  %v2372_v25 = vld [vmem:[#allocation8 + $0x190] sm:$0xf] }
 0x104   :  { %v924_v26 = vmax.f32 %v915_v28, 0.0 }
 0x105   :  { %1674 = vmatpush.bf16.msrb.mxu0 %v2181_v9  ;;  %1710 = vmatpush.bf16.msrb.mxu2 %v2185_v57  ;;  %v2710_v57 = vld [vmem:[#allocation8 + $0x224] sm:$0xf] }
 0x106   :  { %v2449_v49 = vor.u32 %v2710_v57, %v2446_v16 }
 0x107   :  { %v898_v55 = vpop.f32.mrf.mxu2  ;;  %v865_v59 = vpop.f32.mrf.mxu0 }
 0x108   :  { %v916_v21 = vpop.f32.mrf.mxu3  ;;  %v899_v56 = vadd.f32 %v898_v55, %v881_v48  ;;  %v883_v46 = vpop.f32.mrf.mxu1  ;;  %1603 = vmatmul.bf16.vlgmr.msra.gmra.mxu0 %v3049_v13  ;;  %1639 = vmatmul.bf16.vlgmr.msra.gmra.mxu2 %v3049_v13  ;;  %v866_v27 = vadd.f32 %v865_v59, %v848_v23  ;;  %v2704_v48 = vld [vmem:[#allocation8 + $0x1f4] sm:$0xf]  ;;  %v2707_v55 = vld [vmem:[#allocation8 + $0x204] sm:$0xf0]  ;;  %v2398_v59 = vld [vmem:[#allocation8 + $0x1d8] sm:$0xf0] }
 0x109   :  { %v2421_v28 = vor.u32 %v2707_v55, %v2420_v53  ;;  %v2692_v23 = vld [vmem:[#allocation8 + $0x194] sm:$0xf] }
 0x10a   :  { %v917_v24 = vadd.f32 %v916_v21, %v899_v56  ;;  %v884_v38 = vadd.f32 %v883_v46, %v866_v27  ;;  %v2425_v21 = vor.u32 %v2704_v48, %v2422_v54  ;;  %v2698_v56 = vld [vmem:[#allocation8 + $0x1c4] sm:$0xf]  ;;  %v2396_v46 = vld [vmem:[#allocation8 + $0x1c0] sm:$0xf] }
 0x10b   :  { %v2401_v62 = vor.u32 %v2698_v56, %v2398_v59  ;;  %v2397_v22 = vor.u32 %v2701_v17, %v2396_v46 }
 0x10c   :  { %v926_v7 = vmax.f32 %v917_v24, 0.0  ;;  %v2374_v24 = vld [vmem:[#allocation8 + $0x1a8] sm:$0xf0] }
 0x10d   :  { %v2377_v52 = vor.u32 %v2692_v23, %v2374_v24 }
 0x10e   :  { %v3080_v30 = vpack.c.bf16 %v926_v7, %v924_v26  ;;  %v2373_v26 = vor.u32 %v2695_v50, %v2372_v25 }
 0x10f   :  { %v901_v36 = vpop.f32.mrf.mxu2  ;;  %v867_v39 = vpop.f32.mrf.mxu0 }
 0x110   :  { %v919_v32 = vpop.f32.mrf.mxu3  ;;  %1549 = vmatmul.bf16.vlgmr.msrb.gmra.mxu1 %v3080_v30  ;;  %1585 = vmatmul.bf16.vlgmr.msrb.gmra.mxu3 %v3080_v30  ;;  %v885_v29 = vpop.f32.mrf.mxu1  ;;  %v902_v47 = vadd.f32 %v901_v36, %v884_v38 }
 0x111   :  { %1721 = vmatpush.bf16.msrb.mxu3 %v2545_v37  ;;  %1685 = vmatpush.bf16.msrb.mxu1 %v2541_v10  ;;  %v3094_v37 = vld [vmem:[#allocation10] sm:$0x3f] }
 0x112   :  { %v920_v33 = vadd.f32 %v919_v32, %v902_v47  ;;  %v1034_v19 = vperm.slane %v3094_v37, 3 }
 0x114   :  { %v928_v6 = vmax.f32 %v920_v33, 0.0 }
 0x115   :  { %1722 = vmatpush.bf16.msrb.mxu3 %v2521_v14  ;;  %1686 = vmatpush.bf16.msrb.mxu1 %v2517_v51 }
 0x116   :  { %v932_v9 = vpack.c.bf16 %v928_v6, %v928_v6 }
 0x117   :  { %v903_v2 = vpop.f32.mrf.mxu2 }
 0x118   :  { %v921_v3 = vpop.f32.mrf.mxu3  ;;  %1608 = vmatmul.bf16.gmra.mxu0 %v3067_v45  ;;  %1644 = vmatmul.bf16.gmra.mxu2 %v3067_v45 }
 0x119   :  { %1723 = vmatpush.bf16.msrb.mxu3 %v2497_v12  ;;  %1687 = vmatpush.bf16.msrb.mxu1 %v2493_v1 }
 0x11d   :  { %1724 = vmatpush.bf16.msrb.mxu3 %v2473_v8  ;;  %1688 = vmatpush.bf16.msrb.mxu1 %v2469_v40 }
 0x120   :  { %1554 = vmatmul.bf16.gmra.mxu1 %v932_v9  ;;  %1590 = vmatmul.bf16.gmra.mxu3 %v932_v9 }
 0x121   :  { %1725 = vmatpush.bf16.msrb.mxu3 %v2449_v49  ;;  %1689 = vmatpush.bf16.msrb.mxu1 %v2445_v20 }
 0x125   :  { %1726 = vmatpush.bf16.msrb.mxu3 %v2425_v21  ;;  %1690 = vmatpush.bf16.msrb.mxu1 %v2421_v28 }
 0x128   :  { %1675 = vmatmul.bf16.vlgmr.msrb.gmra.mxu0 %v3049_v13  ;;  %1711 = vmatmul.bf16.vlgmr.msrb.gmra.mxu2 %v3049_v13 }
 0x129   :  { %1727 = vmatpush.bf16.msrb.mxu3 %v2401_v62  ;;  %1691 = vmatpush.bf16.msrb.mxu1 %v2397_v22 }
 0x12d   :  { %1728 = vmatpush.bf16.msrb.mxu3 %v2377_v52  ;;  %1692 = vmatpush.bf16.msrb.mxu1 %v2373_v26 }
 0x130   :  { %1621 = vmatmul.bf16.vlgmr.msra.gmra.mxu1 %v3080_v30  ;;  %1657 = vmatmul.bf16.vlgmr.msra.gmra.mxu3 %v3080_v30 }
 0x138   :  { %1680 = vmatmul.bf16.gmra.mxu0 %v3067_v45  ;;  %1716 = vmatmul.bf16.gmra.mxu2 %v3067_v45  ;;  %v1031_v45 = vperm.slane %v3094_v37, 0 }
 0x140   :  { %1626 = vmatmul.bf16.gmra.mxu1 %v932_v9  ;;  %1662 = vmatmul.bf16.gmra.mxu3 %v932_v9 }
 0x150   :  { %1693 = vmatmul.bf16.vlgmr.msrb.gmra.mxu1 %v3080_v30  ;;  %1729 = vmatmul.bf16.vlgmr.msrb.gmra.mxu3 %v3080_v30  ;;  %v1032_v30 = vperm.slane %v3094_v37, 1 }
 0x160   :  { %1698 = vmatmul.bf16.gmra.mxu1 %v932_v9  ;;  %1734 = vmatmul.bf16.gmra.mxu3 %v932_v9  ;;  %v1033_v9 = vperm.slane %v3094_v37, 2 }
 0x165   :  { %v1532_v13 = vpop.f32.mrf.mxu0 }
 0x166   :  { %v1533_v38 = vadd.f32 %v1532_v13, %v1031_v45 }
 0x16b   :  { %v1568_v7 = vpop.f32.mrf.mxu2 }
 0x16c   :  { %v1569_v42 = vadd.f32 %v1568_v7, %v1032_v30 }
 0x16d   :  { %v1534_v27 = vpop.f32.mrf.mxu0 }
 0x16e   :  { %v1535_v14 = vadd.f32 %v1534_v27, %v1031_v45 }
 0x173   :  { %v1570_v31 = vpop.f32.mrf.mxu2 }
 0x174   :  { %v1571_v63 = vadd.f32 %v1570_v31, %v1032_v30 }
 0x175   :  { %v1537_v34 = vpop.f32.mrf.mxu0 }
 0x176   :  { %v1538_v33 = vadd.f32 %v1537_v34, %v1031_v45  ;;  %v1035_v34 = vperm.slane %v3094_v37, 4 }
 0x17b   :  { %v1573_v11 = vpop.f32.mrf.mxu2 }
 0x17c   :  { %v1574_v15 = vadd.f32 %v1573_v11, %v1032_v30 }
 0x17d   :  { %v1539_v36 = vpop.f32.mrf.mxu0 }
 0x183   :  { %v1575_v32 = vpop.f32.mrf.mxu2 }
 0x185   :  { %v1604_v35 = vpop.f32.mrf.mxu0 }
 0x186   :  { %v1605_v16 = vadd.f32 %v1604_v35, %v1033_v9  ;;  %v1036_v35 = vperm.slane %v3094_v37, 5 }
 0x18b   :  { %v1640_v39 = vpop.f32.mrf.mxu2 }
 0x18c   :  { %v1641_v54 = vadd.f32 %v1640_v39, %v1034_v19 }
 0x18d   :  { %v1550_v29 = vpop.f32.mrf.mxu1  ;;  %v1606_v41 = vpop.f32.mrf.mxu0 }
 0x18e   :  { %v1551_v10 = vadd.f32 %v1550_v29, %v1533_v38  ;;  %v1607_v55 = vadd.f32 %v1606_v41, %v1033_v9 }
 0x190   :  { %1739 = vst [vmem:[#allocation11] sm:$0xff] %v1551_v10 }
 0x193   :  { %v1586_v43 = vpop.f32.mrf.mxu3  ;;  %v1642_v47 = vpop.f32.mrf.mxu2 }
 0x194   :  { %v1587_v44 = vadd.f32 %v1586_v43, %v1569_v42  ;;  %v1643_v17 = vadd.f32 %v1642_v47, %v1034_v19 }
 0x195   :  { %v1552_v51 = vpop.f32.mrf.mxu1  ;;  %v1609_v61 = vpop.f32.mrf.mxu0 }
 0x196   :  { %1740 = vst [vmem:[#allocation11 + $0x8] sm:$0xff] %v1587_v44  ;;  %v1553_v60 = vadd.f32 %v1552_v51, %v1535_v14  ;;  %v1610_v22 = vadd.f32 %v1609_v61, %v1033_v9 }
 0x198   :  { %1745 = vst [vmem:[#allocation11 + $0x30] sm:$0xff] %v1553_v60 }
 0x19b   :  { %v1588_v0 = vpop.f32.mrf.mxu3  ;;  %v1645_v1 = vpop.f32.mrf.mxu2 }
 0x19c   :  { %v1589_v12 = vadd.f32 %v1588_v0, %v1571_v63  ;;  %v1646_v26 = vadd.f32 %v1645_v1, %v1034_v19 }
 0x19d   :  { %v1555_v2 = vpop.f32.mrf.mxu1  ;;  %v1611_v4 = vpop.f32.mrf.mxu0 }
 0x19e   :  { %1746 = vst [vmem:[#allocation11 + $0x38] sm:$0xff] %v1589_v12  ;;  %v1556_v3 = vadd.f32 %v1555_v2, %v1538_v33 }
 0x1a0   :  { %1751 = vst [vmem:[#allocation11 + $0x60] sm:$0xf] %v1556_v3 }
 0x1a3   :  { %v1591_v5 = vpop.f32.mrf.mxu3  ;;  %v1647_v8 = vpop.f32.mrf.mxu2 }
 0x1a4   :  { %v1592_v6 = vadd.f32 %v1591_v5, %v1574_v15 }
 0x1a5   :  { %v1557_v58 = vpop.f32.mrf.mxu1  ;;  %v1676_v40 = vpop.f32.mrf.mxu0 }
 0x1a6   :  { %1752 = vst [vmem:[#allocation11 + $0x68] sm:$0xf] %v1592_v6  ;;  %v1677_v36 = vadd.f32 %v1676_v40, %v1035_v34 }
 0x1ab   :  { %v1593_v57 = vpop.f32.mrf.mxu3  ;;  %v1712_v18 = vpop.f32.mrf.mxu2 }
 0x1ac   :  { %v1713_v38 = vadd.f32 %v1712_v18, %v1036_v35 }
 0x1ad   :  { %v1622_v49 = vpop.f32.mrf.mxu1  ;;  %v1678_v48 = vpop.f32.mrf.mxu0 }
 0x1ae   :  { %v1623_v20 = vadd.f32 %v1622_v49, %v1605_v16  ;;  %v1679_v29 = vadd.f32 %v1678_v48, %v1035_v34 }
 0x1b0   :  { %1741 = vst [vmem:[#allocation11 + $0x10] sm:$0xff] %v1623_v20 }
 0x1b3   :  { %v1658_v53 = vpop.f32.mrf.mxu3  ;;  %v1714_v28 = vpop.f32.mrf.mxu2 }
 0x1b4   :  { %v1659_v21 = vadd.f32 %v1658_v53, %v1641_v54  ;;  %v1715_v42 = vadd.f32 %v1714_v28, %v1036_v35 }
 0x1b5   :  { %v1624_v56 = vpop.f32.mrf.mxu1  ;;  %v1681_v46 = vpop.f32.mrf.mxu0 }
 0x1b6   :  { %1742 = vst [vmem:[#allocation11 + $0x18] sm:$0xff] %v1659_v21  ;;  %v1625_v59 = vadd.f32 %v1624_v56, %v1607_v55  ;;  %v1682_v14 = vadd.f32 %v1681_v46, %v1035_v34 }
 0x1b8   :  { %1747 = vst [vmem:[#allocation11 + $0x40] sm:$0xff] %v1625_v59 }
 0x1bb   :  { %v1660_v62 = vpop.f32.mrf.mxu3  ;;  %v1717_v24 = vpop.f32.mrf.mxu2 }
 0x1bc   :  { %v1661_v23 = vadd.f32 %v1660_v62, %v1643_v17  ;;  %v1718_v37 = vadd.f32 %v1717_v24, %v1036_v35 }
 0x1bd   :  { %v1627_v25 = vpop.f32.mrf.mxu1  ;;  %v1683_v52 = vpop.f32.mrf.mxu0 }
 0x1be   :  { %1748 = vst [vmem:[#allocation11 + $0x48] sm:$0xff] %v1661_v23  ;;  %v1628_v50 = vadd.f32 %v1627_v25, %v1610_v22 }
 0x1c0   :  { %1753 = vst [vmem:[#allocation11 + $0x70] sm:$0xf] %v1628_v50 }
 0x1c3   :  { %v1663_v13 = vpop.f32.mrf.mxu3  ;;  %v1719_v27 = vpop.f32.mrf.mxu2 }
 0x1c4   :  { %v1664_v7 = vadd.f32 %v1663_v13, %v1646_v26 }
 0x1c5   :  { %v1629_v31 = vpop.f32.mrf.mxu1 }
 0x1c6   :  { %1754 = vst [vmem:[#allocation11 + $0x78] sm:$0xf] %v1664_v7 }
 0x1cb   :  { %v1665_v11 = vpop.f32.mrf.mxu3 }
 0x1cd   :  { %v1694_v32 = vpop.f32.mrf.mxu1 }
 0x1ce   :  { %v1695_v45 = vadd.f32 %v1694_v32, %v1677_v36 }
 0x1d0   :  { %1743 = vst [vmem:[#allocation11 + $0x20] sm:$0xff] %v1695_v45 }
 0x1d3   :  { %v1730_v39 = vpop.f32.mrf.mxu3 }
 0x1d4   :  { %v1731_v30 = vadd.f32 %v1730_v39, %v1713_v38 }
 0x1d5   :  { %v1696_v10 = vpop.f32.mrf.mxu1 }
 0x1d6   :  { %1744 = vst [vmem:[#allocation11 + $0x28] sm:$0xff] %v1731_v30  ;;  %v1697_v41 = vadd.f32 %v1696_v10, %v1679_v29 }
 0x1d8   :  { %1749 = vst [vmem:[#allocation11 + $0x50] sm:$0xff] %v1697_v41 }
 0x1db   :  { %v1732_v43 = vpop.f32.mrf.mxu3 }
 0x1dc   :  { %v1733_v44 = vadd.f32 %v1732_v43, %v1715_v42 }
 0x1dd   :  { %v1699_v47 = vpop.f32.mrf.mxu1 }
 0x1de   :  { %1750 = vst [vmem:[#allocation11 + $0x58] sm:$0xff] %v1733_v44  ;;  %v1700_v51 = vadd.f32 %v1699_v47, %v1682_v14 }
 0x1e0   :  { %1755 = vst [vmem:[#allocation11 + $0x80] sm:$0xf] %v1700_v51 }
 0x1e3   :  { %v1735_v60 = vpop.f32.mrf.mxu3 }
 0x1e4   :  { %v1736_v61 = vadd.f32 %v1735_v60, %v1718_v37 }
 0x1e5   :  { %v1701_v63 = vpop.f32.mrf.mxu1 }
 0x1e6   :  { %1756 = vst [vmem:[#allocation11 + $0x88] sm:$0xf] %v1736_v61 }
 0x1e7   :  { %1769 = dma.vmem_to_hbm [thread:$0]  %s1762_s4, 2304, %s1764_s23, [#allocation4], %s2909_s13, %s2909_s13, %s2910_s14  }
 0x1eb   :  { %v1737_v0 = vpop.f32.mrf.mxu3 }
 0x1ec   :  { %2900 = dma.done.wait [#allocation4], 2304  }
 0x1ed   :  { %2901 = vsyncadd [#allocation4], 4294964992 }
 0x1ee   :  { %1774 = vsyncpa [#allocation3], 1 }
 0x1ef   :  { %1775 = vsyncpa [#allocation6], 1 }
 0x1f0   :  { %1776 = vsyncpa [#allocation9], 1 }
 0x1f1   :  { %1777 = vsyncpa [#allocation4], 1 }

</bundles_post_ra>
